<compile_context>
chip_gen: v7x
topology: tpu7x:2x2x1
jax: 0.10.0
libtpu: 0.0.40
codegen_flags: <defaults>
</compile_context>

<pallas_src>
import functools

import numpy as np
import jax
import jax.numpy as jnp
from jax import lax
from jax.experimental import pallas as pl
from jax.experimental.pallas import tpu as pltpu

NEG_SLOPE = 0.01  # nn.LeakyReLU() default negative slope


# ----------------------- host-side constant matrices (cached on shapes) -----------------------
@functools.lru_cache(maxsize=None)
def _shift_operators(Hn, Wn):
    """9 weight-independent (Sn, Sn) shift matrices for a 3x3 / padding=1 conv on a flattened
    (Hn*Wn,) map: conv_out_flat = sum_t w[t] * (in_flat @ ops[t])."""
    S = Hn * Wn
    ops = np.zeros((9, S, S), dtype=np.float32)
    for di in range(3):
        for dj in range(3):
            t = di * 3 + dj
            for i in range(Hn):
                ii = i + di - 1
                if not (0 <= ii < Hn):
                    continue
                for j in range(Wn):
                    jj = j + dj - 1
                    if not (0 <= jj < Wn):
                        continue
                    ops[t, ii * Wn + jj, i * Wn + j] = 1.0
    return jnp.asarray(ops)


def _bilinear_matrix(out_size, in_size):
    """1-D bilinear interpolation matrix (out_size, in_size), align_corners=False."""
    R = np.zeros((out_size, in_size), dtype=np.float32)
    scale = in_size / out_size
    for o in range(out_size):
        s = max((o + 0.5) * scale - 0.5, 0.0)
        i0 = min(int(np.floor(s)), in_size - 1)
        i1 = min(i0 + 1, in_size - 1)
        lam = s - i0
        R[o, i0] += 1.0 - lam
        R[o, i1] += lam
    return R


@functools.lru_cache(maxsize=None)
def _bilinear_kron_matrix(H, W, h, w):
    """(h*w, H*W) M such that up_flat = x_flat @ M for a bilinear resize (h,w)->(H,W)."""
    return jnp.asarray(np.kron(_bilinear_matrix(H, h), _bilinear_matrix(W, w)).T)


def _pick_batch_block(N, C):
    """Samples per grid step: aim for >=128 MXU LHS rows (NB*C); NB must divide N."""
    target = max(1, -(-128 // max(C, 1)))
    nb = min(N, target)
    while N % nb != 0:
        nb -= 1
    return max(nb, 1)


# --------------------------------- fused Pallas kernel ----------------------------------------
def _make_fused_kernel(K, is_identity, NB, Co, S, write_ups):
    n_mats = sum(1 for ident in is_identity if not ident)

    def kernel(*refs):
        i = 0
        noise_ref = refs[i]; i += 1                      # (NB, Cn, Sn)
        base_ref = refs[i]; i += 1                       # (NB, Co, S)
        x_refs = refs[i:i + K]; i += K                   # K x (NB, Co, Sk)
        mavg_ref = refs[i]; mmax_ref = refs[i + 1]; cb_ref = refs[i + 2]; i += 3
        w1_ref, b1_ref, w2_ref, b2_ref, w3_ref, b3_ref = refs[i:i + 6]; i += 6
        m_refs = refs[i:i + n_mats]; i += n_mats         # (Sk, S) interpolation matrices
        final_ref = refs[i]; i += 1                      # (NB, Co, S)
        up_refs = refs[i:i + K] if write_ups else ()

        # ---- noise gate: channel avg/max -> 3x3 conv (two MXU matmuls, no lane concat)
        noise = noise_ref[...]                           # (NB, Cn, Sn)
        avg = jnp.mean(noise, axis=1)                    # (NB, Sn)
        mx = jnp.max(noise, axis=1)                      # (NB, Sn)
        ctx = jax.nn.sigmoid(
            jnp.dot(avg, mavg_ref[...], preferred_element_type=jnp.float32)
            + jnp.dot(mx, mmax_ref[...], preferred_element_type=jnp.float32)
            + cb_ref[...])                               # (NB, Sn)

        gated = noise * ctx[:, None, :]                  # (NB, Cn, Sn)
        pooled = jnp.mean(gated, axis=2)                 # (NB, Cn)  spatial mean pool

        # ---- tiny MLP + softmax -> per-sample mixing weights
        def leaky(v):
            return jnp.where(v > 0, v, NEG_SLOPE * v)

        h = leaky(jnp.dot(pooled, w1_ref[...], preferred_element_type=jnp.float32) + b1_ref[...])
        h = leaky(jnp.dot(h, w2_ref[...], preferred_element_type=jnp.float32) + b2_ref[...])
        logits = jnp.dot(h, w3_ref[...], preferred_element_type=jnp.float32) + b3_ref[...]
        m = jnp.max(logits, axis=-1, keepdims=True)
        e = jnp.exp(logits - m)
        weights = e / jnp.sum(e, axis=-1, keepdims=True)  # (NB, num_outputs); only [:, :K] used

        # ---- bilinear upsample (batched MXU matmul) + weighted residual combine
        acc = base_ref[...]                               # (NB, Co, S)
        mat_idx = 0
        for k in range(K):
            xk = x_refs[k][...]                           # (NB, Co, Sk)
            if is_identity[k]:
                up = xk                                   # resize to same size == identity
            else:
                Sk = xk.shape[-1]
                up = jnp.dot(xk.reshape(NB * Co, Sk), m_refs[mat_idx][...],
                             preferred_element_type=jnp.float32).reshape(NB, Co, S)
                mat_idx += 1
            if write_ups:
                up_refs[k][...] = up
            acc = acc + weights[:, k:k + 1, None] * up
        final_ref[...] = acc

    return kernel


# ------------------------------------- wrapper -------------------------------------------
def hierarchical_res_block_pallas(output, intermediate_outputs, noise, params,
                                  return_intermediates=True):
    N, Cn, Hn, Wn = noise.shape
    Nb, Co, H, W = output.shape
    assert N == Nb
    K = len(intermediate_outputs)
    Sn, S = Hn * Wn, H * W
    num_outputs = params['W3'].shape[1]
    assert num_outputs >= K

    # constant matrices: cached shift operators, conv weights folded in at trace time
    shift_ops = _shift_operators(Hn, Wn)                              # (9, Sn, Sn)
    w9 = params['conv_w'].astype(jnp.float32).reshape(2, 9)
    m_avg = jnp.tensordot(w9[0], shift_ops, axes=1)                   # (Sn, Sn)
    m_max = jnp.tensordot(w9[1], shift_ops, axes=1)                   # (Sn, Sn)

    is_identity = tuple((x.shape[2], x.shape[3]) == (H, W) for x in intermediate_outputs)
    interp_mats = [_bilinear_kron_matrix(H, W, x.shape[2], x.shape[3])
                   for x, ident in zip(intermediate_outputs, is_identity) if not ident]

    NB = _pick_batch_block(N, Co)
    grid = (N // NB,)

    # free reshapes: NCHW -> (N, C, H*W); C on sublanes, flattened spatial on lanes
    noise_flat = noise.reshape(N, Cn, Sn)
    out_flat = output.reshape(N, Co, S)
    xs = [x.reshape(N, Co, x.shape[2] * x.shape[3]) for x in intermediate_outputs]

    def blk(c, s):
        return pl.BlockSpec((NB, c, s), lambda b: (b, 0, 0))

    def const_spec(shape):
        nd = len(shape)
        return pl.BlockSpec(shape, lambda b, _nd=nd: (0,) * _nd)

    const_arrays = [m_avg, m_max, params['conv_b'].reshape(1, 1).astype(jnp.float32),
                    params['W1'], params['b1'].reshape(1, -1),
                    params['W2'], params['b2'].reshape(1, -1),
                    params['W3'], params['b3'].reshape(1, -1)] + list(interp_mats)

    in_specs = [blk(Cn, Sn), blk(Co, S)]
    in_specs += [blk(Co, x.shape[-1]) for x in xs]
    in_specs += [const_spec(a.shape) for a in const_arrays]

    n_out = 1 + (K if return_intermediates else 0)
    out_shape = tuple(jax.ShapeDtypeStruct((N, Co, S), jnp.float32) for _ in range(n_out))
    out_specs = tuple(blk(Co, S) for _ in range(n_out))

    kernel = _make_fused_kernel(K, is_identity, NB, Co, S, return_intermediates)
    results = pl.pallas_call(
        kernel,
        grid=grid,
        in_specs=in_specs,
        out_specs=out_specs,
        out_shape=out_shape,
        compiler_params=pltpu.CompilerParams(dimension_semantics=("parallel",)),
    )(noise_flat, out_flat, *xs, *const_arrays)

    final = results[0].reshape(N, Co, H, W)
    if not return_intermediates:
        return final, None
    ups = [r.reshape(N, Co, H, W) for r in results[1:]]
    return final, ups


# --------------------------- deterministic parameter init --------------------------------
def init_params(key, noise_channels, hidden_dim, num_outputs):
    ks = jax.random.split(key, 8)
    return {
        'conv_w': 0.3 * jax.random.normal(ks[0], (1, 2, 3, 3), jnp.float32),
        'conv_b': 0.1 * jax.random.normal(ks[1], (1,), jnp.float32),
        'W1': 0.2 * jax.random.normal(ks[2], (noise_channels, hidden_dim), jnp.float32),
        'b1': 0.1 * jax.random.normal(ks[3], (hidden_dim,), jnp.float32),
        'W2': 0.2 * jax.random.normal(ks[4], (hidden_dim, hidden_dim), jnp.float32),
        'b2': 0.1 * jax.random.normal(ks[5], (hidden_dim,), jnp.float32),
        'W3': 0.2 * jax.random.normal(ks[6], (hidden_dim, num_outputs), jnp.float32),
        'b3': 0.1 * jax.random.normal(ks[7], (num_outputs,), jnp.float32),
    }


# ------------------------------ pure-JAX reference ---------------------------------------
def _bilinear_resize_ref(x, H, W):
    N, C, h, w = x.shape

    def idx(out_size, in_size):
        scale = in_size / out_size
        s = np.maximum((np.arange(out_size) + 0.5) * scale - 0.5, 0.0)
        i0 = np.minimum(np.floor(s).astype(np.int32), in_size - 1)
        i1 = np.minimum(i0 + 1, in_size - 1)
        lam = (s - i0).astype(np.float32)
        return i0, i1, lam

    r0, r1, rl = idx(H, h)
    c0, c1, cl = idx(W, w)
    rl = jnp.asarray(rl).reshape(1, 1, H, 1)
    cl = jnp.asarray(cl).reshape(1, 1, 1, W)
    xt = x[:, :, r0, :] * (1.0 - rl) + x[:, :, r1, :] * rl          # rows
    return xt[:, :, :, c0] * (1.0 - cl) + xt[:, :, :, c1] * cl      # cols


def hierarchical_res_block_ref(output, intermediate_outputs, noise, params):
    avg = jnp.mean(noise, axis=1, keepdims=True)
    mx = jnp.max(noise, axis=1, keepdims=True)
    ctx_in = jnp.concatenate([avg, mx], axis=1)
    conv = lax.conv_general_dilated(
        ctx_in, params['conv_w'], (1, 1), ((1, 1), (1, 1)),
        dimension_numbers=('NCHW', 'OIHW', 'NCHW'))
    ctx = jax.nn.sigmoid(conv + params['conv_b'].reshape(1, -1, 1, 1))
    gated = noise * ctx
    pooled = gated.mean(axis=(2, 3))

    def leaky(v):
        return jnp.where(v > 0, v, NEG_SLOPE * v)

    h = leaky(pooled @ params['W1'] + params['b1'])
    h = leaky(h @ params['W2'] + params['b2'])
    w = jax.nn.softmax(h @ params['W3'] + params['b3'], axis=-1)

    H, W = output.shape[2], output.shape[3]
    ups = [_bilinear_resize_ref(x, H, W) for x in intermediate_outputs]
    out = output
    for k in range(len(intermediate_outputs)):
        out = out + ups[k] * w[:, k].reshape(-1, 1, 1, 1)
    return out, ups


# ---------------------------------------- main --------------------------------------------
if __name__ == "__main__":
    N, C_noise, Hn, Wn = 2, 8, 16, 16
    C_out, H, W = 8, 16, 16
    hidden_dim, num_outputs = 32, 3
    inter_sizes = [(4, 4), (8, 8), (16, 16)]   # last one == output size -> identity skip path

    key = jax.random.PRNGKey(0)
    keys = jax.random.split(key, 6)
    noise = jax.random.normal(keys[0], (N, C_noise, Hn, Wn), jnp.float32)
    output = jax.random.normal(keys[1], (N, C_out, H, W), jnp.float32)
    intermediates = [jax.random.normal(keys[2 + i], (N, C_out, h, w), jnp.float32)
                     for i, (h, w) in enumerate(inter_sizes)]
    params = init_params(keys[5], C_noise, hidden_dim, num_outputs)

    out, ups = hierarchical_res_block_pallas(output, intermediates, noise, params)
    out = jax.block_until_ready(out)

    ref_out, ref_ups = hierarchical_res_block_ref(output, intermediates, noise, params)
    assert out.shape == (N, C_out, H, W)
    max_err = float(jnp.max(jnp.abs(out - ref_out)))
    for u, ru in zip(ups, ref_ups):
        max_err = max(max_err, float(jnp.max(jnp.abs(u - ru))))
    assert max_err < 1e-4, f"mismatch vs reference: {max_err}"

    print("KERNEL_OK")
</pallas_src>

<mosaic_0001>
module attributes {stable_mosaic.version = 11 : i64} {
  func.func @kernel(%arg0: i32, %arg1: memref<2x8x256xf32, #tpu.memory_space<vmem>>, %arg2: memref<2x8x256xf32, #tpu.memory_space<vmem>>, %arg3: memref<2x8x16xf32, #tpu.memory_space<vmem>>, %arg4: memref<2x8x64xf32, #tpu.memory_space<vmem>>, %arg5: memref<2x8x256xf32, #tpu.memory_space<vmem>>, %arg6: memref<256x256xf32, #tpu.memory_space<vmem>>, %arg7: memref<256x256xf32, #tpu.memory_space<vmem>>, %arg8: memref<1x1xf32, #tpu.memory_space<vmem>>, %arg9: memref<8x32xf32, #tpu.memory_space<vmem>>, %arg10: memref<1x32xf32, #tpu.memory_space<vmem>>, %arg11: memref<32x32xf32, #tpu.memory_space<vmem>>, %arg12: memref<1x32xf32, #tpu.memory_space<vmem>>, %arg13: memref<32x3xf32, #tpu.memory_space<vmem>>, %arg14: memref<1x3xf32, #tpu.memory_space<vmem>>, %arg15: memref<16x256xf32, #tpu.memory_space<vmem>>, %arg16: memref<64x256xf32, #tpu.memory_space<vmem>>, %arg17: memref<2x8x256xf32, #tpu.memory_space<vmem>>, %arg18: memref<2x8x256xf32, #tpu.memory_space<vmem>>, %arg19: memref<2x8x256xf32, #tpu.memory_space<vmem>>, %arg20: memref<2x8x256xf32, #tpu.memory_space<vmem>>) attributes {dimension_semantics = [#tpu.dimension_semantics<parallel>], iteration_bounds = array<i64: 1>, scalar_prefetch = 0 : i64, scratch_operands = 0 : i64, tpu.core_type = #tpu.core_type<tc>, window_params = [{transform_indices = @transform_0, window_bounds = array<i64: 2, 8, 256>}, {transform_indices = @transform_1, window_bounds = array<i64: 2, 8, 256>}, {transform_indices = @transform_2, window_bounds = array<i64: 2, 8, 16>}, {transform_indices = @transform_3, window_bounds = array<i64: 2, 8, 64>}, {transform_indices = @transform_4, window_bounds = array<i64: 2, 8, 256>}, {pipeline_mode = #tpu.pipeline_mode<synchronous>, transform_indices = @transform_5, window_bounds = array<i64: 256, 256>}, {pipeline_mode = #tpu.pipeline_mode<synchronous>, transform_indices = @transform_6, window_bounds = array<i64: 256, 256>}, {pipeline_mode = #tpu.pipeline_mode<synchronous>, transform_indices = @transform_7, window_bounds = array<i64: 1, 1>}, {pipeline_mode = #tpu.pipeline_mode<synchronous>, transform_indices = @transform_8, window_bounds = array<i64: 8, 32>}, {pipeline_mode = #tpu.pipeline_mode<synchronous>, transform_indices = @transform_9, window_bounds = array<i64: 1, 32>}, {pipeline_mode = #tpu.pipeline_mode<synchronous>, transform_indices = @transform_10, window_bounds = array<i64: 32, 32>}, {pipeline_mode = #tpu.pipeline_mode<synchronous>, transform_indices = @transform_11, window_bounds = array<i64: 1, 32>}, {pipeline_mode = #tpu.pipeline_mode<synchronous>, transform_indices = @transform_12, window_bounds = array<i64: 32, 3>}, {pipeline_mode = #tpu.pipeline_mode<synchronous>, transform_indices = @transform_13, window_bounds = array<i64: 1, 3>}, {pipeline_mode = #tpu.pipeline_mode<synchronous>, transform_indices = @transform_14, window_bounds = array<i64: 16, 256>}, {pipeline_mode = #tpu.pipeline_mode<synchronous>, transform_indices = @transform_15, window_bounds = array<i64: 64, 256>}, {transform_indices = @transform_16, window_bounds = array<i64: 2, 8, 256>}, {transform_indices = @transform_17, window_bounds = array<i64: 2, 8, 256>}, {transform_indices = @transform_18, window_bounds = array<i64: 2, 8, 256>}, {transform_indices = @transform_19, window_bounds = array<i64: 2, 8, 256>}]} {
    %c0 = arith.constant 0 : index
    %c0_0 = arith.constant 0 : index
    %c0_1 = arith.constant 0 : index
    %0 = vector.load %arg1[%c0, %c0_0, %c0_1] : memref<2x8x256xf32, #tpu.memory_space<vmem>>, vector<2x8x256xf32>
    %cst = arith.constant dense<0.000000e+00> : vector<2x256xf32>
    %1 = vector.multi_reduction <add>, %0, %cst [1] : vector<2x8x256xf32> to vector<2x256xf32>
    %cst_2 = arith.constant 8.000000e+00 : f32
    %2 = vector.broadcast %cst_2 : f32 to vector<2x256xf32>
    %3 = arith.divf %1, %2 : vector<2x256xf32>
    %cst_3 = arith.constant dense<0xFF800000> : vector<2x256xf32>
    %4 = vector.multi_reduction <maximumf>, %0, %cst_3 [1] : vector<2x8x256xf32> to vector<2x256xf32>
    %c0_4 = arith.constant 0 : index
    %c0_5 = arith.constant 0 : index
    %5 = vector.load %arg6[%c0_4, %c0_5] : memref<256x256xf32, #tpu.memory_space<vmem>>, vector<256x256xf32>
    %cst_6 = arith.constant dense<0.000000e+00> : vector<2x256xf32>
    %6 = tpu.matmul %3, %5, %cst_6 {dimension_numbers = #tpu.dot_dimension_numbers<[1], [0], [0], [1], [0, 0, 1, 1], [], []>} : vector<2x256xf32>, vector<256x256xf32>, vector<2x256xf32> -> vector<2x256xf32>
    %c0_7 = arith.constant 0 : index
    %c0_8 = arith.constant 0 : index
    %7 = vector.load %arg7[%c0_7, %c0_8] : memref<256x256xf32, #tpu.memory_space<vmem>>, vector<256x256xf32>
    %cst_9 = arith.constant dense<0.000000e+00> : vector<2x256xf32>
    %8 = tpu.matmul %4, %7, %cst_9 {dimension_numbers = #tpu.dot_dimension_numbers<[1], [0], [0], [1], [0, 0, 1, 1], [], []>} : vector<2x256xf32>, vector<256x256xf32>, vector<2x256xf32> -> vector<2x256xf32>
    %9 = arith.addf %6, %8 : vector<2x256xf32>
    %c0_10 = arith.constant 0 : index
    %c0_11 = arith.constant 0 : index
    %10 = vector.load %arg8[%c0_10, %c0_11] : memref<1x1xf32, #tpu.memory_space<vmem>>, vector<1x1xf32>
    %11 = vector.broadcast %10 : vector<1x1xf32> to vector<2x256xf32>
    %12 = arith.addf %9, %11 : vector<2x256xf32>
    %13 = arith.negf %12 : vector<2x256xf32>
    %14 = math.exp %13 : vector<2x256xf32>
    %cst_12 = arith.constant 1.000000e+00 : f32
    %15 = vector.broadcast %cst_12 : f32 to vector<2x256xf32>
    %16 = arith.addf %15, %14 : vector<2x256xf32>
    %17 = arith.divf %15, %16 : vector<2x256xf32>
    %18 = vector.shape_cast %17 : vector<2x256xf32> to vector<2x1x256xf32>
    %19 = vector.broadcast %18 : vector<2x1x256xf32> to vector<2x8x256xf32>
    %20 = arith.mulf %0, %19 : vector<2x8x256xf32>
    %cst_13 = arith.constant dense<0.000000e+00> : vector<2x8xf32>
    %21 = vector.multi_reduction <add>, %20, %cst_13 [2] : vector<2x8x256xf32> to vector<2x8xf32>
    %cst_14 = arith.constant 2.560000e+02 : f32
    %22 = vector.broadcast %cst_14 : f32 to vector<2x8xf32>
    %23 = arith.divf %21, %22 : vector<2x8xf32>
    %c0_15 = arith.constant 0 : index
    %c0_16 = arith.constant 0 : index
    %24 = vector.load %arg9[%c0_15, %c0_16] : memref<8x32xf32, #tpu.memory_space<vmem>>, vector<8x32xf32>
    %cst_17 = arith.constant dense<0.000000e+00> : vector<2x32xf32>
    %25 = tpu.matmul %23, %24, %cst_17 {dimension_numbers = #tpu.dot_dimension_numbers<[1], [0], [0], [1], [0, 0, 1, 1], [], []>} : vector<2x8xf32>, vector<8x32xf32>, vector<2x32xf32> -> vector<2x32xf32>
    %c0_18 = arith.constant 0 : index
    %c0_19 = arith.constant 0 : index
    %26 = vector.load %arg10[%c0_18, %c0_19] : memref<1x32xf32, #tpu.memory_space<vmem>>, vector<1x32xf32>
    %27 = vector.broadcast %26 : vector<1x32xf32> to vector<2x32xf32>
    %28 = arith.addf %25, %27 : vector<2x32xf32>
    %cst_20 = arith.constant 0.000000e+00 : f32
    %29 = vector.broadcast %cst_20 : f32 to vector<2x32xf32>
    %30 = arith.cmpf ogt, %28, %29 : vector<2x32xf32>
    %cst_21 = arith.constant 0.00999999977 : f32
    %31 = vector.broadcast %cst_21 : f32 to vector<2x32xf32>
    %32 = arith.mulf %31, %28 : vector<2x32xf32>
    %33 = arith.select %30, %28, %32 : vector<2x32xi1>, vector<2x32xf32>
    %c0_22 = arith.constant 0 : index
    %c0_23 = arith.constant 0 : index
    %34 = vector.load %arg11[%c0_22, %c0_23] : memref<32x32xf32, #tpu.memory_space<vmem>>, vector<32x32xf32>
    %cst_24 = arith.constant dense<0.000000e+00> : vector<2x32xf32>
    %35 = tpu.matmul %33, %34, %cst_24 {dimension_numbers = #tpu.dot_dimension_numbers<[1], [0], [0], [1], [0, 0, 1, 1], [], []>} : vector<2x32xf32>, vector<32x32xf32>, vector<2x32xf32> -> vector<2x32xf32>
    %c0_25 = arith.constant 0 : index
    %c0_26 = arith.constant 0 : index
    %36 = vector.load %arg12[%c0_25, %c0_26] : memref<1x32xf32, #tpu.memory_space<vmem>>, vector<1x32xf32>
    %37 = vector.broadcast %36 : vector<1x32xf32> to vector<2x32xf32>
    %38 = arith.addf %35, %37 : vector<2x32xf32>
    %cst_27 = arith.constant 0.000000e+00 : f32
    %39 = vector.broadcast %cst_27 : f32 to vector<2x32xf32>
    %40 = arith.cmpf ogt, %38, %39 : vector<2x32xf32>
    %cst_28 = arith.constant 0.00999999977 : f32
    %41 = vector.broadcast %cst_28 : f32 to vector<2x32xf32>
    %42 = arith.mulf %41, %38 : vector<2x32xf32>
    %43 = arith.select %40, %38, %42 : vector<2x32xi1>, vector<2x32xf32>
    %c0_29 = arith.constant 0 : index
    %c0_30 = arith.constant 0 : index
    %44 = vector.load %arg13[%c0_29, %c0_30] : memref<32x3xf32, #tpu.memory_space<vmem>>, vector<32x3xf32>
    %cst_31 = arith.constant dense<0.000000e+00> : vector<2x3xf32>
    %45 = tpu.matmul %43, %44, %cst_31 {dimension_numbers = #tpu.dot_dimension_numbers<[1], [0], [0], [1], [0, 0, 1, 1], [], []>} : vector<2x32xf32>, vector<32x3xf32>, vector<2x3xf32> -> vector<2x3xf32>
    %c0_32 = arith.constant 0 : index
    %c0_33 = arith.constant 0 : index
    %46 = vector.load %arg14[%c0_32, %c0_33] : memref<1x3xf32, #tpu.memory_space<vmem>>, vector<1x3xf32>
    %47 = vector.broadcast %46 : vector<1x3xf32> to vector<2x3xf32>
    %48 = arith.addf %45, %47 : vector<2x3xf32>
    %cst_34 = arith.constant dense<0xFF800000> : vector<2xf32>
    %49 = vector.multi_reduction <maximumf>, %48, %cst_34 [1] : vector<2x3xf32> to vector<2xf32>
    %50 = vector.shape_cast %49 : vector<2xf32> to vector<2x1xf32>
    %51 = vector.broadcast %50 : vector<2x1xf32> to vector<2x3xf32>
    %52 = arith.subf %48, %51 : vector<2x3xf32>
    %53 = math.exp %52 : vector<2x3xf32>
    %cst_35 = arith.constant dense<0.000000e+00> : vector<2xf32>
    %54 = vector.multi_reduction <add>, %53, %cst_35 [1] : vector<2x3xf32> to vector<2xf32>
    %55 = vector.shape_cast %54 : vector<2xf32> to vector<2x1xf32>
    %56 = vector.broadcast %55 : vector<2x1xf32> to vector<2x3xf32>
    %57 = arith.divf %53, %56 : vector<2x3xf32>
    %c0_36 = arith.constant 0 : index
    %c0_37 = arith.constant 0 : index
    %c0_38 = arith.constant 0 : index
    %58 = vector.load %arg2[%c0_36, %c0_37, %c0_38] : memref<2x8x256xf32, #tpu.memory_space<vmem>>, vector<2x8x256xf32>
    %c0_39 = arith.constant 0 : index
    %c0_40 = arith.constant 0 : index
    %c0_41 = arith.constant 0 : index
    %59 = vector.load %arg3[%c0_39, %c0_40, %c0_41] : memref<2x8x16xf32, #tpu.memory_space<vmem>>, vector<2x8x16xf32>
    %60 = vector.shape_cast %59 : vector<2x8x16xf32> to vector<16x16xf32>
    %c0_42 = arith.constant 0 : index
    %c0_43 = arith.constant 0 : index
    %61 = vector.load %arg15[%c0_42, %c0_43] : memref<16x256xf32, #tpu.memory_space<vmem>>, vector<16x256xf32>
    %cst_44 = arith.constant dense<0.000000e+00> : vector<16x256xf32>
    %62 = tpu.matmul %60, %61, %cst_44 {dimension_numbers = #tpu.dot_dimension_numbers<[1], [0], [0], [1], [0, 0, 1, 1], [], []>} : vector<16x16xf32>, vector<16x256xf32>, vector<16x256xf32> -> vector<16x256xf32>
    %63 = vector.shape_cast %62 : vector<16x256xf32> to vector<2x8x256xf32>
    %c0_45 = arith.constant 0 : index
    %c0_46 = arith.constant 0 : index
    %c0_47 = arith.constant 0 : index
    %64 = vector.load %arg18[%c0_45, %c0_46, %c0_47] : memref<2x8x256xf32, #tpu.memory_space<vmem>>, vector<2x8x256xf32>
    tpu.vector_store %arg18[%c0_45, %c0_46, %c0_47], %63 {strides = array<i32>} : memref<2x8x256xf32, #tpu.memory_space<vmem>>, vector<2x8x256xf32>,
    %65 = vector.extract_strided_slice %57 {offsets = [0, 0], sizes = [2, 1], strides = [1, 1]} : vector<2x3xf32> to vector<2x1xf32>
    %66 = vector.shape_cast %65 : vector<2x1xf32> to vector<2x1x1xf32>
    %67 = vector.broadcast %66 : vector<2x1x1xf32> to vector<2x8x256xf32>
    %68 = arith.mulf %67, %63 : vector<2x8x256xf32>
    %69 = arith.addf %58, %68 : vector<2x8x256xf32>
    %c0_48 = arith.constant 0 : index
    %c0_49 = arith.constant 0 : index
    %c0_50 = arith.constant 0 : index
    %70 = vector.load %arg4[%c0_48, %c0_49, %c0_50] : memref<2x8x64xf32, #tpu.memory_space<vmem>>, vector<2x8x64xf32>
    %71 = vector.shape_cast %70 : vector<2x8x64xf32> to vector<16x64xf32>
    %c0_51 = arith.constant 0 : index
    %c0_52 = arith.constant 0 : index
    %72 = vector.load %arg16[%c0_51, %c0_52] : memref<64x256xf32, #tpu.memory_space<vmem>>, vector<64x256xf32>
    %cst_53 = arith.constant dense<0.000000e+00> : vector<16x256xf32>
    %73 = tpu.matmul %71, %72, %cst_53 {dimension_numbers = #tpu.dot_dimension_numbers<[1], [0], [0], [1], [0, 0, 1, 1], [], []>} : vector<16x64xf32>, vector<64x256xf32>, vector<16x256xf32> -> vector<16x256xf32>
    %74 = vector.shape_cast %73 : vector<16x256xf32> to vector<2x8x256xf32>
    %c0_54 = arith.constant 0 : index
    %c0_55 = arith.constant 0 : index
    %c0_56 = arith.constant 0 : index
    %75 = vector.load %arg19[%c0_54, %c0_55, %c0_56] : memref<2x8x256xf32, #tpu.memory_space<vmem>>, vector<2x8x256xf32>
    tpu.vector_store %arg19[%c0_54, %c0_55, %c0_56], %74 {strides = array<i32>} : memref<2x8x256xf32, #tpu.memory_space<vmem>>, vector<2x8x256xf32>,
    %76 = vector.extract_strided_slice %57 {offsets = [0, 1], sizes = [2, 1], strides = [1, 1]} : vector<2x3xf32> to vector<2x1xf32>
    %77 = vector.shape_cast %76 : vector<2x1xf32> to vector<2x1x1xf32>
    %78 = vector.broadcast %77 : vector<2x1x1xf32> to vector<2x8x256xf32>
    %79 = arith.mulf %78, %74 : vector<2x8x256xf32>
    %80 = arith.addf %69, %79 : vector<2x8x256xf32>
    %c0_57 = arith.constant 0 : index
    %c0_58 = arith.constant 0 : index
    %c0_59 = arith.constant 0 : index
    %81 = vector.load %arg5[%c0_57, %c0_58, %c0_59] : memref<2x8x256xf32, #tpu.memory_space<vmem>>, vector<2x8x256xf32>
    %c0_60 = arith.constant 0 : index
    %c0_61 = arith.constant 0 : index
    %c0_62 = arith.constant 0 : index
    %82 = vector.load %arg20[%c0_60, %c0_61, %c0_62] : memref<2x8x256xf32, #tpu.memory_space<vmem>>, vector<2x8x256xf32>
    tpu.vector_store %arg20[%c0_60, %c0_61, %c0_62], %81 {strides = array<i32>} : memref<2x8x256xf32, #tpu.memory_space<vmem>>, vector<2x8x256xf32>,
    %83 = vector.extract_strided_slice %57 {offsets = [0, 2], sizes = [2, 1], strides = [1, 1]} : vector<2x3xf32> to vector<2x1xf32>
    %84 = vector.shape_cast %83 : vector<2x1xf32> to vector<2x1x1xf32>
    %85 = vector.broadcast %84 : vector<2x1x1xf32> to vector<2x8x256xf32>
    %86 = arith.mulf %85, %81 : vector<2x8x256xf32>
    %87 = arith.addf %80, %86 : vector<2x8x256xf32>
    %c0_63 = arith.constant 0 : index
    %c0_64 = arith.constant 0 : index
    %c0_65 = arith.constant 0 : index
    %88 = vector.load %arg17[%c0_63, %c0_64, %c0_65] : memref<2x8x256xf32, #tpu.memory_space<vmem>>, vector<2x8x256xf32>
    tpu.vector_store %arg17[%c0_63, %c0_64, %c0_65], %87 {strides = array<i32>} : memref<2x8x256xf32, #tpu.memory_space<vmem>>, vector<2x8x256xf32>,
    return
  }
  func.func @transform_0(%arg0: i32) -> (i32, i32, i32) {
    %c0_i32 = arith.constant 0 : i32
    %c0_i32_0 = arith.constant 0 : i32
    %c0_i32_1 = arith.constant 0 : i32
    return %arg0, %c0_i32, %c0_i32_0 : i32, i32, i32
  }
  func.func @transform_1(%arg0: i32) -> (i32, i32, i32) {
    %c0_i32 = arith.constant 0 : i32
    %c0_i32_0 = arith.constant 0 : i32
    %c0_i32_1 = arith.constant 0 : i32
    return %arg0, %c0_i32, %c0_i32_0 : i32, i32, i32
  }
  func.func @transform_2(%arg0: i32) -> (i32, i32, i32) {
    %c0_i32 = arith.constant 0 : i32
    %c0_i32_0 = arith.constant 0 : i32
    %c0_i32_1 = arith.constant 0 : i32
    return %arg0, %c0_i32, %c0_i32_0 : i32, i32, i32
  }
  func.func @transform_3(%arg0: i32) -> (i32, i32, i32) {
    %c0_i32 = arith.constant 0 : i32
    %c0_i32_0 = arith.constant 0 : i32
    %c0_i32_1 = arith.constant 0 : i32
    return %arg0, %c0_i32, %c0_i32_0 : i32, i32, i32
  }
  func.func @transform_4(%arg0: i32) -> (i32, i32, i32) {
    %c0_i32 = arith.constant 0 : i32
    %c0_i32_0 = arith.constant 0 : i32
    %c0_i32_1 = arith.constant 0 : i32
    return %arg0, %c0_i32, %c0_i32_0 : i32, i32, i32
  }
  func.func @transform_5(%arg0: i32) -> (i32, i32) {
    %c0_i32 = arith.constant 0 : i32
    %c0_i32_0 = arith.constant 0 : i32
    %c0_i32_1 = arith.constant 0 : i32
    return %c0_i32, %c0_i32_0 : i32, i32
  }
  func.func @transform_6(%arg0: i32) -> (i32, i32) {
    %c0_i32 = arith.constant 0 : i32
    %c0_i32_0 = arith.constant 0 : i32
    %c0_i32_1 = arith.constant 0 : i32
    return %c0_i32, %c0_i32_0 : i32, i32
  }
  func.func @transform_7(%arg0: i32) -> (i32, i32) {
    %c0_i32 = arith.constant 0 : i32
    %c0_i32_0 = arith.constant 0 : i32
    %c0_i32_1 = arith.constant 0 : i32
    return %c0_i32, %c0_i32_0 : i32, i32
  }
  func.func @transform_8(%arg0: i32) -> (i32, i32) {
    %c0_i32 = arith.constant 0 : i32
    %c0_i32_0 = arith.constant 0 : i32
    %c0_i32_1 = arith.constant 0 : i32
    return %c0_i32, %c0_i32_0 : i32, i32
  }
  func.func @transform_9(%arg0: i32) -> (i32, i32) {
    %c0_i32 = arith.constant 0 : i32
    %c0_i32_0 = arith.constant 0 : i32
    %c0_i32_1 = arith.constant 0 : i32
    return %c0_i32, %c0_i32_0 : i32, i32
  }
  func.func @transform_10(%arg0: i32) -> (i32, i32) {
    %c0_i32 = arith.constant 0 : i32
    %c0_i32_0 = arith.constant 0 : i32
    %c0_i32_1 = arith.constant 0 : i32
    return %c0_i32, %c0_i32_0 : i32, i32
  }
  func.func @transform_11(%arg0: i32) -> (i32, i32) {
    %c0_i32 = arith.constant 0 : i32
    %c0_i32_0 = arith.constant 0 : i32
    %c0_i32_1 = arith.constant 0 : i32
    return %c0_i32, %c0_i32_0 : i32, i32
  }
  func.func @transform_12(%arg0: i32) -> (i32, i32) {
    %c0_i32 = arith.constant 0 : i32
    %c0_i32_0 = arith.constant 0 : i32
    %c0_i32_1 = arith.constant 0 : i32
    return %c0_i32, %c0_i32_0 : i32, i32
  }
  func.func @transform_13(%arg0: i32) -> (i32, i32) {
    %c0_i32 = arith.constant 0 : i32
    %c0_i32_0 = arith.constant 0 : i32
    %c0_i32_1 = arith.constant 0 : i32
    return %c0_i32, %c0_i32_0 : i32, i32
  }
  func.func @transform_14(%arg0: i32) -> (i32, i32) {
    %c0_i32 = arith.constant 0 : i32
    %c0_i32_0 = arith.constant 0 : i32
    %c0_i32_1 = arith.constant 0 : i32
    return %c0_i32, %c0_i32_0 : i32, i32
  }
  func.func @transform_15(%arg0: i32) -> (i32, i32) {
    %c0_i32 = arith.constant 0 : i32
    %c0_i32_0 = arith.constant 0 : i32
    %c0_i32_1 = arith.constant 0 : i32
    return %c0_i32, %c0_i32_0 : i32, i32
  }
  func.func @transform_16(%arg0: i32) -> (i32, i32, i32) {
    %c0_i32 = arith.constant 0 : i32
    %c0_i32_0 = arith.constant 0 : i32
    %c0_i32_1 = arith.constant 0 : i32
    return %arg0, %c0_i32, %c0_i32_0 : i32, i32, i32
  }
  func.func @transform_17(%arg0: i32) -> (i32, i32, i32) {
    %c0_i32 = arith.constant 0 : i32
    %c0_i32_0 = arith.constant 0 : i32
    %c0_i32_1 = arith.constant 0 : i32
    return %arg0, %c0_i32, %c0_i32_0 : i32, i32, i32
  }
  func.func @transform_18(%arg0: i32) -> (i32, i32, i32) {
    %c0_i32 = arith.constant 0 : i32
    %c0_i32_0 = arith.constant 0 : i32
    %c0_i32_1 = arith.constant 0 : i32
    return %arg0, %c0_i32, %c0_i32_0 : i32, i32, i32
  }
  func.func @transform_19(%arg0: i32) -> (i32, i32, i32) {
    %c0_i32 = arith.constant 0 : i32
    %c0_i32_0 = arith.constant 0 : i32
    %c0_i32_1 = arith.constant 0 : i32
    return %arg0, %c0_i32, %c0_i32_0 : i32, i32, i32
  }
}

</mosaic_0001>

<bundles_post_ra>
// kernel: tpu_custom_call.1
= control target key start
LH: loop header
LB: loop body
LE: loop exit
PB: predicated region body
PF: predicated region fallthrough
CT: control target
= control target key end

     0   :  { %s2351_s0 = inlined_call_operand.vmem [shape: f32[2,8,256], index: 0, kind: input, shape index: {}]   ;;  %s2352_s1 = inlined_call_operand.hbm [shape: f32[2,8,256], index: 1, kind: input, shape index: {}]   ;;  %s2353_s2 = inlined_call_operand.hbm [shape: f32[2,8,16], index: 2, kind: input, shape index: {}]   ;;  %s2354_s3 = inlined_call_operand.hbm [shape: f32[2,8,64], index: 3, kind: input, shape index: {}]   ;;  %s2355_s4 = inlined_call_operand.hbm [shape: f32[2,8,256], index: 4, kind: input, shape index: {}]   ;;  %s2356_s5 = inlined_call_operand.hbm [shape: f32[256,256], index: 5, kind: input, shape index: {}]   ;;  %s2357_s6 = inlined_call_operand.hbm [shape: f32[256,256], index: 6, kind: input, shape index: {}]   ;;  %s2358_s7 = inlined_call_operand.<no memory space> [shape: f32[1,1], index: 7, kind: input, shape index: {}]   ;;  %s2359_s8 = inlined_call_operand.hbm [shape: f32[8,32], index: 8, kind: input, shape index: {}]   ;;  %s2360_s9 = inlined_call_operand.vmem [shape: f32[1,32], index: 9, kind: input, shape index: {}]   ;;  %s2361_s10 = inlined_call_operand.vmem [shape: f32[32,32], index: 10, kind: input, shape index: {}]   ;;  %s2362_s11 = inlined_call_operand.vmem [shape: f32[1,32], index: 11, kind: input, shape index: {}]   ;;  %s2363_s12 = inlined_call_operand.vmem [shape: f32[32,3], index: 12, kind: input, shape index: {}]   ;;  %s2364_s13 = inlined_call_operand.vmem [shape: f32[1,3], index: 13, kind: input, shape index: {}]   ;;  %s2365_s14 = inlined_call_operand.hbm [shape: f32[16,256], index: 14, kind: input, shape index: {}]   ;;  %s2366_s15 = inlined_call_operand.hbm [shape: f32[64,256], index: 15, kind: input, shape index: {}]   ;;  %s2367_s16 = inlined_call_operand.hbm [shape: f32[2,8,256], index: 16, kind: output, shape index: {0}]   ;;  %s2368_s17 = inlined_call_operand.hbm [shape: f32[2,8,256], index: 17, kind: output, shape index: {1}]   ;;  %s2369_s18 = inlined_call_operand.hbm [shape: f32[2,8,256], index: 18, kind: output, shape index: {2}]   ;;  %s2370_s19 = inlined_call_operand.hbm [shape: f32[2,8,256], index: 19, kind: output, shape index: {3}]  }
   0x1   :  { %2376 = sst [smem:[#allocation32_spill]] %s2351_s0  ;;  %v25_v0 = vstv %s2358_s7 }
   0x2   :  { %2377 = sst [smem:[#allocation33_spill]] %s2352_s1  ;;  %26 = vst [vmem:[#allocation2] sm:$0x1] %v25_v0 }
   0x3   :  { %2378 = sst [smem:[#allocation34_spill]] %s2353_s2 }
   0x4   :  { %2379 = sst [smem:[#allocation35_spill]] %s2354_s3 }
   0x5   :  { %2380 = sst [smem:[#allocation36_spill]] %s2367_s16 }
   0x6   :  { %27 = vsyncpa [#allocation4], 0 }
   0x7   :  { %28 = vsyncpa [#allocation7], 0 }
   0x8   :  { %29 = vsyncpa [#allocation10], 0 }
   0x9   :  { %30 = vsyncpa [#allocation13], 0 }
   0xa   :  { %31 = vsyncpa [#allocation16], 0 }
   0xb   :  { %32 = vsyncpa [#allocation5], 0 }
   0xc   :  { %33 = vsyncpa [#allocation20], 0 }
   0xd   :  { %34 = vsyncpa [#allocation23], 0  ;;  %s1811_s20 = smov [#allocation6]   ;;  %s2381_s2 = sld [smem:[#allocation34_spill]] }
   0xe   :  { %s54_s21 = sshll.u32 %s1811_s20, 4  ;;  %s55_s21 = int_to_ptr.vmem [resolvable:$true] %s54_s21 }
  0x13   :  { %s1509_s23 = scalar_lea.hbm %s2381_s2, 256 }
  0x14   :  { %p1510_p0 = scmp.ne.s32.totalorder %s2381_s2, %s1509_s23  ;;  %p1513_p1 = scmp.lt.u32.totalorder %s1509_s23, %s2381_s2 }
  0x16   :  { %p1515_p2 = pnand %p1513_p1, %p1510_p0 }
  0x18   :  { %1518 = shalt.err (!%p1515_p2)
}
  0x19   :  { %s1519_s26 = scalar_lea.vmem %s55_s21, 256  ;;  %p1524_p4 = scmp.lt.s32.totalorder %s55_s21, %s55_s21 }
  0x1a   :  { %p1520_p3 = scmp.ne.s32.totalorder %s55_s21, %s1519_s26  ;;  %p1525_p5 = scmp.lt.s32.totalorder %s1519_s26, %s1519_s26 }
  0x1c   :  { %p1526_p6 = por %p1525_p5, %p1524_p4 }
  0x1e   :  { %p1527_p7 = pnand %p1526_p6, %p1520_p3 }
  0x20   :  { %1530 = shalt.err (!%p1527_p7)
}
  0x21   :  { %s1812_s27 = smov 128   ;;  %s1813_s28 = smov 8  }
  0x22   :  { %60 = dma.hbm_to_vmem [thread:$0]  %s2381_s2, 256, %s55_s21, [#allocation7], %s1812_s27, %s1812_s27, %s1813_s28  }
  0x23   :  { %s1814_s30 = smov [#allocation9]   ;;  %s1815_s1 = smov [#allocation12]  }
  0x24   :  { %s78_s20 = sshll.u32 %s1814_s30, 4  ;;  %s102_s22 = sshll.u32 %s1815_s1, 4  ;;  %s79_s20 = int_to_ptr.vmem [resolvable:$true] %s78_s20  ;;  %s103_s22 = int_to_ptr.vmem [resolvable:$true] %s102_s22 }
  0x25   :  { %s1531_s25 = scalar_lea.hbm %s2355_s4, 512 }
  0x26   :  { %p1532_p8 = scmp.ne.s32.totalorder %s2355_s4, %s1531_s25  ;;  %p1535_p9 = scmp.lt.u32.totalorder %s1531_s25, %s2355_s4 }
  0x28   :  { %p1537_p10 = pnand %p1535_p9, %p1532_p8 }
  0x2a   :  { %1540 = shalt.err (!%p1537_p10)
}
  0x2b   :  { %s1541_s21 = scalar_lea.vmem %s79_s20, 512  ;;  %p1546_p12 = scmp.lt.s32.totalorder %s79_s20, %s79_s20 }
  0x2c   :  { %p1542_p11 = scmp.ne.s32.totalorder %s79_s20, %s1541_s21  ;;  %p1547_p13 = scmp.lt.s32.totalorder %s1541_s21, %s1541_s21 }
  0x2e   :  { %p1548_p0 = por %p1547_p13, %p1546_p12 }
  0x30   :  { %p1549_p1 = pnand %p1548_p0, %p1542_p11 }
  0x32   :  { %1552 = shalt.err (!%p1549_p1)
}
  0x33   :  { %s1816_s2 = smov 256   ;;  %s1817_s29 = smov 16  }
  0x34   :  { %84 = dma.hbm_to_vmem [thread:$0]  %s2355_s4, 512, %s79_s20, [#allocation10], %s1816_s2, %s1816_s2, %s1817_s29  }
  0x35   :  { %s1553_s23 = scalar_lea.hbm %s2357_s6, 8192 }
  0x36   :  { %p1554_p2 = scmp.ne.s32.totalorder %s2357_s6, %s1553_s23  ;;  %p1557_p3 = scmp.lt.u32.totalorder %s1553_s23, %s2357_s6 }
  0x38   :  { %p1559_p4 = pnand %p1557_p3, %p1554_p2 }
  0x3a   :  { %1562 = shalt.err (!%p1559_p4)
}
  0x3b   :  { %s1563_s26 = scalar_lea.vmem %s103_s22, 8192  ;;  %p1568_p6 = scmp.lt.s32.totalorder %s103_s22, %s103_s22 }
  0x3c   :  { %p1564_p5 = scmp.ne.s32.totalorder %s103_s22, %s1563_s26  ;;  %p1569_p7 = scmp.lt.s32.totalorder %s1563_s26, %s1563_s26 }
  0x3e   :  { %p1570_p8 = por %p1569_p7, %p1568_p6 }
  0x40   :  { %p1571_p9 = pnand %p1570_p8, %p1564_p5 }
  0x42   :  { %1574 = shalt.err (!%p1571_p9)
}
  0x43   :  { %108 = dma.hbm_to_vmem [thread:$0]  %s2357_s6, 8192, %s103_s22, [#allocation13], %s1816_s2, %s1816_s2, %s1817_s29  }
  0x44   :  { %s1818_s21 = smov [#allocation15]   ;;  %s1819_s30 = smov [#allocation3]  }
  0x45   :  { %s136_s0 = sshll.u32 %s1818_s21, 4  ;;  %s42_s16 = sshll.u32 %s1819_s30, 4  ;;  %s137_s0 = int_to_ptr.vmem [resolvable:$true] %s136_s0  ;;  %s43_s16 = int_to_ptr.vmem [resolvable:$true] %s42_s16 }
  0x46   :  { %s1575_s24 = scalar_lea.hbm %s2365_s14, 512 }
  0x47   :  { %p1576_p10 = scmp.ne.s32.totalorder %s2365_s14, %s1575_s24  ;;  %p1579_p11 = scmp.lt.u32.totalorder %s1575_s24, %s2365_s14 }
  0x49   :  { %p1581_p12 = pnand %p1579_p11, %p1576_p10 }
  0x4b   :  { %1584 = shalt.err (!%p1581_p12)
}
  0x4c   :  { %s1585_s6 = scalar_lea.vmem %s137_s0, 512  ;;  %p1590_p0 = scmp.lt.s32.totalorder %s137_s0, %s137_s0 }
  0x4d   :  { %p1586_p13 = scmp.ne.s32.totalorder %s137_s0, %s1585_s6  ;;  %p1591_p1 = scmp.lt.s32.totalorder %s1585_s6, %s1585_s6 }
  0x4f   :  { %p1592_p2 = por %p1591_p1, %p1590_p0 }
  0x51   :  { %p1593_p3 = pnand %p1592_p2, %p1586_p13 }
  0x53   :  { %1596 = shalt.err (!%p1593_p3)
}
  0x54   :  { %142 = dma.hbm_to_vmem [thread:$0]  %s2365_s14, 512, %s137_s0, [#allocation16], %s1816_s2, %s1816_s2, %s1817_s29  }
  0x55   :  { %s2382_s30 = sld [smem:[#allocation33_spill]] }
  0x5b   :  { %s1597_s1 = scalar_lea.hbm %s2382_s30, 512 }
  0x5c   :  { %p1598_p4 = scmp.ne.s32.totalorder %s2382_s30, %s1597_s1  ;;  %p1601_p5 = scmp.lt.u32.totalorder %s1597_s1, %s2382_s30 }
  0x5e   :  { %p1603_p6 = pnand %p1601_p5, %p1598_p4 }
  0x60   :  { %1606 = shalt.err (!%p1603_p6)
}
  0x61   :  { %s1607_s3 = scalar_lea.vmem %s43_s16, 512  ;;  %p1612_p8 = scmp.lt.s32.totalorder %s43_s16, %s43_s16 }
  0x62   :  { %p1608_p7 = scmp.ne.s32.totalorder %s43_s16, %s1607_s3  ;;  %p1613_p9 = scmp.lt.s32.totalorder %s1607_s3, %s1607_s3 }
  0x64   :  { %p1614_p10 = por %p1613_p9, %p1612_p8 }
  0x66   :  { %p1615_p11 = pnand %p1614_p10, %p1608_p7 }
  0x68   :  { %1618 = shalt.err (!%p1615_p11)
}
  0x69   :  { %48 = dma.hbm_to_vmem [thread:$0]  %s2382_s30, 512, %s43_s16, [#allocation4], %s1816_s2, %s1816_s2, %s1817_s29  }
  0x6a   :  { %s1820_s26 = smov [#allocation8]   ;;  %s1821_s22 = smov [#allocation11]  }
  0x6b   :  { %s66_s6 = sshll.u32 %s1820_s26, 4  ;;  %s90_s4 = sshll.u32 %s1821_s22, 4  ;;  %s67_s6 = int_to_ptr.vmem [resolvable:$true] %s66_s6  ;;  %s91_s4 = int_to_ptr.vmem [resolvable:$true] %s90_s4 }
  0x6c   :  { %s2383_s1 = sld [smem:[#allocation35_spill]] }
  0x72   :  { %s1619_s23 = scalar_lea.hbm %s2383_s1, 256 }
  0x73   :  { %p1620_p12 = scmp.ne.s32.totalorder %s2383_s1, %s1619_s23  ;;  %p1623_p13 = scmp.lt.u32.totalorder %s1619_s23, %s2383_s1 }
  0x75   :  { %p1625_p0 = pnand %p1623_p13, %p1620_p12 }
  0x77   :  { %1628 = shalt.err (!%p1625_p0)
}
  0x78   :  { %s1629_s16 = scalar_lea.vmem %s67_s6, 256  ;;  %p1634_p2 = scmp.lt.s32.totalorder %s67_s6, %s67_s6 }
  0x79   :  { %p1630_p1 = scmp.ne.s32.totalorder %s67_s6, %s1629_s16  ;;  %p1635_p3 = scmp.lt.s32.totalorder %s1629_s16, %s1629_s16 }
  0x7b   :  { %p1636_p4 = por %p1635_p3, %p1634_p2 }
  0x7d   :  { %p1637_p5 = pnand %p1636_p4, %p1630_p1 }
  0x7f   :  { %1640 = shalt.err (!%p1637_p5)
}
  0x80   :  { %72 = dma.hbm_to_vmem [thread:$0]  %s2383_s1, 256, %s67_s6, [#allocation7], %s1812_s27, %s1812_s27, %s1813_s28  }
  0x81   :  { %s1641_s22 = scalar_lea.hbm %s2356_s5, 8192 }
  0x82   :  { %p1642_p6 = scmp.ne.s32.totalorder %s2356_s5, %s1641_s22  ;;  %p1645_p7 = scmp.lt.u32.totalorder %s1641_s22, %s2356_s5 }
  0x84   :  { %p1647_p8 = pnand %p1645_p7, %p1642_p6 }
  0x86   :  { %1650 = shalt.err (!%p1647_p8)
}
  0x87   :  { %s1651_s25 = scalar_lea.vmem %s91_s4, 8192  ;;  %p1656_p10 = scmp.lt.s32.totalorder %s91_s4, %s91_s4 }
  0x88   :  { %p1652_p9 = scmp.ne.s32.totalorder %s91_s4, %s1651_s25  ;;  %p1657_p11 = scmp.lt.s32.totalorder %s1651_s25, %s1651_s25 }
  0x8a   :  { %p1658_p12 = por %p1657_p11, %p1656_p10 }
  0x8c   :  { %p1659_p13 = pnand %p1658_p12, %p1652_p9 }
  0x8e   :  { %1662 = shalt.err (!%p1659_p13)
}
  0x8f   :  { %96 = dma.hbm_to_vmem [thread:$0]  %s2356_s5, 8192, %s91_s4, [#allocation10], %s1816_s2, %s1816_s2, %s1817_s29  }
  0x90   :  { %s1822_s6 = smov [#allocation14]   ;;  %s1823_s7 = smov [#allocation17]  }
  0x91   :  { %s117_s1 = sshll.u32 %s1822_s6, 4  ;;  %s148_s3 = sshll.u32 %s1823_s7, 4  ;;  %s118_s1 = int_to_ptr.vmem [resolvable:$true] %s117_s1  ;;  %s149_s3 = int_to_ptr.vmem [resolvable:$true] %s148_s3 }
  0x92   :  { %s1663_s14 = scalar_lea.hbm %s2359_s8, 128 }
  0x93   :  { %p1664_p0 = scmp.ne.s32.totalorder %s2359_s8, %s1663_s14  ;;  %p1667_p1 = scmp.lt.u32.totalorder %s1663_s14, %s2359_s8 }
  0x95   :  { %p1669_p2 = pnand %p1667_p1, %p1664_p0 }
  0x97   :  { %1672 = shalt.err (!%p1669_p2)
}
  0x98   :  { %s1673_s5 = scalar_lea.vmem %s118_s1, 128  ;;  %p1678_p4 = scmp.lt.s32.totalorder %s118_s1, %s118_s1 }
  0x99   :  { %p1674_p3 = scmp.ne.s32.totalorder %s118_s1, %s1673_s5  ;;  %p1679_p5 = scmp.lt.s32.totalorder %s1673_s5, %s1673_s5 }
  0x9b   :  { %p1680_p6 = por %p1679_p5, %p1678_p4 }
  0x9d   :  { %p1681_p7 = pnand %p1680_p6, %p1674_p3 }
  0x9f   :  { %1684 = shalt.err (!%p1681_p7)
}
  0xa0   :  { %120 = dma.hbm_to_vmem [thread:$0]  %s2359_s8, 128, %s118_s1, [#allocation13]  }
  0xa1   :  { %s1685_s25 = scalar_lea.hbm %s2366_s15, 2048 }
  0xa2   :  { %p1686_p8 = scmp.ne.s32.totalorder %s2366_s15, %s1685_s25  ;;  %p1689_p9 = scmp.lt.u32.totalorder %s1685_s25, %s2366_s15 }
  0xa4   :  { %p1691_p10 = pnand %p1689_p9, %p1686_p8 }
  0xa6   :  { %1694 = shalt.err (!%p1691_p10)
}
  0xa7   :  { %s1695_s16 = scalar_lea.vmem %s149_s3, 2048  ;;  %p1700_p12 = scmp.lt.s32.totalorder %s149_s3, %s149_s3 }
  0xa8   :  { %p1696_p11 = scmp.ne.s32.totalorder %s149_s3, %s1695_s16  ;;  %p1701_p13 = scmp.lt.s32.totalorder %s1695_s16, %s1695_s16 }
  0xaa   :  { %p1702_p0 = por %p1701_p13, %p1700_p12 }
  0xac   :  { %p1703_p1 = pnand %p1702_p0, %p1696_p11 }
  0xae   :  { %1706 = shalt.err (!%p1703_p1)
}
  0xaf   :  { %154 = dma.hbm_to_vmem [thread:$0]  %s2366_s15, 2048, %s149_s3, [#allocation16], %s1816_s2, %s1816_s2, %s1817_s29  }
  0xb0   :  { %1795 = dma.done.wait [#allocation4], 512  }
  0xb1   :  { %1796 = vsyncadd [#allocation4], 4294966784 }
  0xb2   :  { %1797 = dma.done.wait [#allocation7], 512  }
  0xb3   :  { %1798 = vsyncadd [#allocation7], 4294966784 }
  0xb4   :  { %1799 = dma.done.wait [#allocation10], 8704  }
  0xb5   :  { %1800 = vsyncadd [#allocation10], 4294958592 }
  0xb6   :  { %1801 = dma.done.wait [#allocation13], 8320  }
  0xb7   :  { %1802 = vsyncadd [#allocation13], 4294958976 }
  0xb8   :  { %1803 = dma.done.wait [#allocation16], 2560  }
  0xb9   :  { %1804 = vsyncadd [#allocation16], 4294964736  ;;  %v1824_v1 = vmov 0   ;;  %v304_v2 = vld [vmem:[#allocation12 + $0x8] sm:$0xff]  ;;  %v306_v3 = vld [vmem:[#allocation12 + $0x18] sm:$0xff]  ;;  %s2384_s30 = sld [smem:[#allocation32_spill]] }
  0xba   :  { %1490 = vset.pattern.permute.xlu0 %v1824_v1  ;;  %1491 = vset.pattern.permute.xlu1 %v1824_v1  ;;  %v240_v4 = vld [vmem:[#allocation11 + $0x8] sm:$0xff]  ;;  %v1304_v5 = vpack.c.bf16 %v306_v3, %v304_v2  ;;  %v242_v6 = vld [vmem:[#allocation11 + $0x18] sm:$0xff]  ;;  %v303_v7 = vld [vmem:[#allocation12] sm:$0xff]  ;;  %vm371_vm0 = vcmask 1041409   ;;  %vm1827_vm1 = vmmov 0   ;;  %vm629_vm2 = vcmask 64512  }
  0xbb   :  { %v305_v8 = vld [vmem:[#allocation12 + $0x10] sm:$0xff]  ;;  %v1368_v9 = vpack.c.bf16 %v242_v6, %v240_v4  ;;  %v239_v11 = vld [vmem:[#allocation11] sm:$0xff]  ;;  %v308_v13 = vld [vmem:[#allocation12 + $0x28] sm:$0xff]  ;;  %vm716_vm4 = vcmask 261120   ;;  %vm877_vm6 = vcmask 17408   ;;  %vm899_vm7 = vcmask 130048  }
  0xbc   :  { %v1306_v10 = vpack.c.bf16 %v305_v8, %v303_v7  ;;  %v241_v12 = vld [vmem:[#allocation11 + $0x10] sm:$0xff]  ;;  %1305 = vmatprep.subr.bf16.mxu1 %v1304_v5  ;;  %v310_v15 = vld [vmem:[#allocation12 + $0x38] sm:$0xff]  ;;  %v244_v16 = vld [vmem:[#allocation11 + $0x28] sm:$0xff]  ;;  %vm1052_vm8 = vcmask 523264  }
  0xbd   :  { %v1370_v14 = vpack.c.bf16 %v241_v12, %v239_v11  ;;  %v246_v17 = vld [vmem:[#allocation11 + $0x38] sm:$0xff]  ;;  %1369 = vmatprep.subr.bf16.mxu0 %v1368_v9  ;;  %v1308_v18 = vpack.c.bf16 %v310_v15, %v308_v13  ;;  %v307_v20 = vld [vmem:[#allocation12 + $0x20] sm:$0xff]  ;;  %v309_v21 = vld [vmem:[#allocation12 + $0x30] sm:$0xff] }
  0xbe   :  { %1307 = vmatpush1.bf16.msra.mxu1 %v1306_v10  ;;  %v1372_v19 = vpack.c.bf16 %v246_v17, %v244_v16  ;;  %v243_v22 = vld [vmem:[#allocation11 + $0x20] sm:$0xff]  ;;  %v1310_v23 = vpack.c.bf16 %v309_v21, %v307_v20  ;;  %v245_v24 = vld [vmem:[#allocation11 + $0x30] sm:$0xff]  ;;  %v312_v25 = vld [vmem:[#allocation12 + $0x48] sm:$0xff] }
  0xbf   :  { %1371 = vmatpush1.bf16.msra.mxu0 %v1370_v14  ;;  %v314_v26 = vld [vmem:[#allocation12 + $0x58] sm:$0xff]  ;;  %1309 = vmatprep.subr.bf16.mxu1 %v1308_v18  ;;  %v1374_v27 = vpack.c.bf16 %v245_v24, %v243_v22  ;;  %v248_v29 = vld [vmem:[#allocation11 + $0x48] sm:$0xff]  ;;  %v311_v31 = vld [vmem:[#allocation12 + $0x40] sm:$0xff] }
  0xc0   :  { %1373 = vmatprep.subr.bf16.mxu0 %v1372_v19  ;;  %v1312_v28 = vpack.c.bf16 %v314_v26, %v312_v25  ;;  %v250_v30 = vld [vmem:[#allocation11 + $0x58] sm:$0xff]  ;;  %v313_v33 = vld [vmem:[#allocation12 + $0x50] sm:$0xff]  ;;  %v247_v34 = vld [vmem:[#allocation11 + $0x40] sm:$0xff] }
  0xc1   :  { %v1376_v32 = vpack.c.bf16 %v250_v30, %v248_v29  ;;  %v249_v35 = vld [vmem:[#allocation11 + $0x50] sm:$0xff]  ;;  %v1314_v36 = vpack.c.bf16 %v313_v33, %v311_v31  ;;  %v316_v37 = vld [vmem:[#allocation12 + $0x68] sm:$0xff]  ;;  %v318_v38 = vld [vmem:[#allocation12 + $0x78] sm:$0xff] }
  0xc2   :  { %1311 = vmatpush1.bf16.msra.mxu1 %v1310_v23  ;;  %v252_v39 = vld [vmem:[#allocation11 + $0x68] sm:$0xff]  ;;  %v1378_v40 = vpack.c.bf16 %v249_v35, %v247_v34  ;;  %v1316_v41 = vpack.c.bf16 %v318_v38, %v316_v37  ;;  %v254_v42 = vld [vmem:[#allocation11 + $0x78] sm:$0xff]  ;;  %v315_v43 = vld [vmem:[#allocation12 + $0x60] sm:$0xff] }
  0xc3   :  { %1375 = vmatpush1.bf16.msra.mxu0 %v1374_v27  ;;  %1313 = vmatprep.subr.bf16.mxu1 %v1312_v28  ;;  %v317_v44 = vld [vmem:[#allocation12 + $0x70] sm:$0xff]  ;;  %v1380_v45 = vpack.c.bf16 %v254_v42, %v252_v39  ;;  %v251_v46 = vld [vmem:[#allocation11 + $0x60] sm:$0xff]  ;;  %v320_v48 = vld [vmem:[#allocation12 + $0x88] sm:$0xff] }
  0xc4   :  { %1377 = vmatprep.subr.bf16.mxu0 %v1376_v32  ;;  %v253_v47 = vld [vmem:[#allocation11 + $0x70] sm:$0xff]  ;;  %v322_v49 = vld [vmem:[#allocation12 + $0x98] sm:$0xff]  ;;  %v256_v50 = vld [vmem:[#allocation11 + $0x88] sm:$0xff]  ;;  %v1318_v52 = vpack.c.bf16 %v317_v44, %v315_v43 }
  0xc5   :  { %v258_v51 = vld [vmem:[#allocation11 + $0x98] sm:$0xff]  ;;  %v1382_v53 = vpack.c.bf16 %v253_v47, %v251_v46  ;;  %v1320_v54 = vpack.c.bf16 %v322_v49, %v320_v48  ;;  %v319_v55 = vld [vmem:[#allocation12 + $0x80] sm:$0xff]  ;;  %v321_v56 = vld [vmem:[#allocation12 + $0x90] sm:$0xff] }
  0xc6   :  { %1315 = vmatpush1.bf16.msra.mxu1 %v1314_v36  ;;  %v255_v57 = vld [vmem:[#allocation11 + $0x80] sm:$0xff]  ;;  %v1384_v58 = vpack.c.bf16 %v258_v51, %v256_v50  ;;  %v257_v59 = vld [vmem:[#allocation11 + $0x90] sm:$0xff]  ;;  %v324_v60 = vld [vmem:[#allocation12 + $0xa8] sm:$0xff]  ;;  %v1322_v0 = vpack.c.bf16 %v321_v56, %v319_v55 }
  0xc7   :  { %1379 = vmatpush1.bf16.msra.mxu0 %v1378_v40  ;;  %1317 = vmatprep.subr.bf16.mxu1 %v1316_v41  ;;  %v326_v61 = vld [vmem:[#allocation12 + $0xb8] sm:$0xff]  ;;  %v260_v62 = vld [vmem:[#allocation11 + $0xa8] sm:$0xff]  ;;  %v1386_v2 = vpack.c.bf16 %v257_v59, %v255_v57  ;;  %v323_v4 = vld [vmem:[#allocation12 + $0xa0] sm:$0xff] }
  0xc8   :  { %1381 = vmatprep.subr.bf16.mxu0 %v1380_v45  ;;  %v262_v63 = vld [vmem:[#allocation11 + $0xb8] sm:$0xff]  ;;  %v1324_v3 = vpack.c.bf16 %v326_v61, %v324_v60  ;;  %v325_v5 = vld [vmem:[#allocation12 + $0xb0] sm:$0xff]  ;;  %v259_v6 = vld [vmem:[#allocation11 + $0xa0] sm:$0xff] }
  0xc9   :  { %v1388_v7 = vpack.c.bf16 %v262_v63, %v260_v62  ;;  %v261_v8 = vld [vmem:[#allocation11 + $0xb0] sm:$0xff]  ;;  %v328_v9 = vld [vmem:[#allocation12 + $0xc8] sm:$0xff]  ;;  %v330_v10 = vld [vmem:[#allocation12 + $0xd8] sm:$0xff]  ;;  %v1326_v13 = vpack.c.bf16 %v325_v5, %v323_v4 }
  0xca   :  { %1319 = vmatpush1.bf16.msra.mxu1 %v1318_v52  ;;  %v264_v11 = vld [vmem:[#allocation11 + $0xc8] sm:$0xff]  ;;  %v266_v12 = vld [vmem:[#allocation11 + $0xd8] sm:$0xff]  ;;  %v1390_v14 = vpack.c.bf16 %v261_v8, %v259_v6  ;;  %v1328_v15 = vpack.c.bf16 %v330_v10, %v328_v9  ;;  %v327_v16 = vld [vmem:[#allocation12 + $0xc0] sm:$0xff] }
  0xcb   :  { %1383 = vmatpush1.bf16.msra.mxu0 %v1382_v53  ;;  %1321 = vmatprep.subr.bf16.mxu1 %v1320_v54  ;;  %v329_v17 = vld [vmem:[#allocation12 + $0xd0] sm:$0xff]  ;;  %v263_v18 = vld [vmem:[#allocation11 + $0xc0] sm:$0xff]  ;;  %v1392_v19 = vpack.c.bf16 %v266_v12, %v264_v11  ;;  %v332_v21 = vld [vmem:[#allocation12 + $0xe8] sm:$0xff] }
  0xcc   :  { %1385 = vmatprep.subr.bf16.mxu0 %v1384_v58  ;;  %v265_v20 = vld [vmem:[#allocation11 + $0xd0] sm:$0xff]  ;;  %v334_v22 = vld [vmem:[#allocation12 + $0xf8] sm:$0xff]  ;;  %v268_v23 = vld [vmem:[#allocation11 + $0xe8] sm:$0xff]  ;;  %v1330_v25 = vpack.c.bf16 %v329_v17, %v327_v16 }
  0xcd   :  { %v270_v24 = vld [vmem:[#allocation11 + $0xf8] sm:$0xff]  ;;  %v1394_v26 = vpack.c.bf16 %v265_v20, %v263_v18  ;;  %v1332_v27 = vpack.c.bf16 %v334_v22, %v332_v21  ;;  %v331_v28 = vld [vmem:[#allocation12 + $0xe0] sm:$0xff]  ;;  %v333_v29 = vld [vmem:[#allocation12 + $0xf0] sm:$0xff] }
  0xce   :  { %1323 = vmatpush1.bf16.msra.mxu1 %v1322_v0  ;;  %v267_v30 = vld [vmem:[#allocation11 + $0xe0] sm:$0xff]  ;;  %v1396_v31 = vpack.c.bf16 %v270_v24, %v268_v23  ;;  %v269_v32 = vld [vmem:[#allocation11 + $0xf0] sm:$0xff]  ;;  %v336_v33 = vld [vmem:[#allocation12 + $0x108] sm:$0xff]  ;;  %v1334_v37 = vpack.c.bf16 %v333_v29, %v331_v28 }
  0xcf   :  { %1387 = vmatpush1.bf16.msra.mxu0 %v1386_v2  ;;  %1325 = vmatprep.subr.bf16.mxu1 %v1324_v3  ;;  %v338_v34 = vld [vmem:[#allocation12 + $0x118] sm:$0xff]  ;;  %v272_v35 = vld [vmem:[#allocation11 + $0x108] sm:$0xff]  ;;  %v1398_v38 = vpack.c.bf16 %v269_v32, %v267_v30  ;;  %v335_v40 = vld [vmem:[#allocation12 + $0x100] sm:$0xff] }
  0xd0   :  { %1389 = vmatprep.subr.bf16.mxu0 %v1388_v7  ;;  %v274_v36 = vld [vmem:[#allocation11 + $0x118] sm:$0xff]  ;;  %v1336_v39 = vpack.c.bf16 %v338_v34, %v336_v33  ;;  %v337_v41 = vld [vmem:[#allocation12 + $0x110] sm:$0xff]  ;;  %v271_v42 = vld [vmem:[#allocation11 + $0x100] sm:$0xff] }
  0xd1   :  { %v1400_v43 = vpack.c.bf16 %v274_v36, %v272_v35  ;;  %v273_v44 = vld [vmem:[#allocation11 + $0x110] sm:$0xff]  ;;  %v340_v45 = vld [vmem:[#allocation12 + $0x128] sm:$0xff]  ;;  %v342_v46 = vld [vmem:[#allocation12 + $0x138] sm:$0xff]  ;;  %v1338_v49 = vpack.c.bf16 %v337_v41, %v335_v40 }
  0xd2   :  { %1327 = vmatpush1.bf16.msra.mxu1 %v1326_v13  ;;  %v276_v47 = vld [vmem:[#allocation11 + $0x128] sm:$0xff]  ;;  %v278_v48 = vld [vmem:[#allocation11 + $0x138] sm:$0xff]  ;;  %v339_v50 = vld [vmem:[#allocation12 + $0x120] sm:$0xff]  ;;  %v1402_v51 = vpack.c.bf16 %v273_v44, %v271_v42  ;;  %v1340_v52 = vpack.c.bf16 %v342_v46, %v340_v45 }
  0xd3   :  { %1391 = vmatpush1.bf16.msra.mxu0 %v1390_v14  ;;  %1329 = vmatprep.subr.bf16.mxu1 %v1328_v15  ;;  %v341_v53 = vld [vmem:[#allocation12 + $0x130] sm:$0xff]  ;;  %v275_v54 = vld [vmem:[#allocation11 + $0x120] sm:$0xff]  ;;  %v1404_v56 = vpack.c.bf16 %v278_v48, %v276_v47  ;;  %v344_v57 = vld [vmem:[#allocation12 + $0x148] sm:$0xff] }
  0xd4   :  { %1393 = vmatprep.subr.bf16.mxu0 %v1392_v19  ;;  %v277_v55 = vld [vmem:[#allocation11 + $0x130] sm:$0xff]  ;;  %v346_v58 = vld [vmem:[#allocation12 + $0x158] sm:$0xff]  ;;  %v280_v59 = vld [vmem:[#allocation11 + $0x148] sm:$0xff]  ;;  %v1342_v63 = vpack.c.bf16 %v341_v53, %v339_v50 }
  0xd5   :  { %v282_v60 = vld [vmem:[#allocation11 + $0x158] sm:$0xff]  ;;  %v343_v61 = vld [vmem:[#allocation12 + $0x140] sm:$0xff]  ;;  %v345_v62 = vld [vmem:[#allocation12 + $0x150] sm:$0xff]  ;;  %v1406_v7 = vpack.c.bf16 %v277_v55, %v275_v54  ;;  %v1344_v8 = vpack.c.bf16 %v346_v58, %v344_v57 }
  0xd6   :  { %1331 = vmatpush1.bf16.msra.mxu1 %v1330_v25  ;;  %v279_v0 = vld [vmem:[#allocation11 + $0x140] sm:$0xff]  ;;  %v281_v2 = vld [vmem:[#allocation11 + $0x150] sm:$0xff]  ;;  %v348_v3 = vld [vmem:[#allocation12 + $0x168] sm:$0xff]  ;;  %v1408_v14 = vpack.c.bf16 %v282_v60, %v280_v59  ;;  %v1346_v21 = vpack.c.bf16 %v345_v62, %v343_v61 }
  0xd7   :  { %1395 = vmatpush1.bf16.msra.mxu0 %v1394_v26  ;;  %1333 = vmatprep.subr.bf16.mxu1 %v1332_v27  ;;  %v350_v4 = vld [vmem:[#allocation12 + $0x178] sm:$0xff]  ;;  %v284_v5 = vld [vmem:[#allocation11 + $0x168] sm:$0xff]  ;;  %v2072_v9 = vld [vmem:[#allocation12 + $0x160] sm:$0xff]  ;;  %v1410_v25 = vpack.c.bf16 %v281_v2, %v279_v0 }
  0xd8   :  { %1397 = vmatprep.subr.bf16.mxu0 %v1396_v31  ;;  %v286_v6 = vld [vmem:[#allocation11 + $0x178] sm:$0xff]  ;;  %v2074_v10 = vld [vmem:[#allocation12 + $0x170] sm:$0xff]  ;;  %v2076_v11 = vld [vmem:[#allocation11 + $0x160] sm:$0xff]  ;;  %v1348_v26 = vpack.c.bf16 %v350_v4, %v348_v3 }
  0xd9   :  { %v2078_v12 = vld [vmem:[#allocation11 + $0x170] sm:$0xff]  ;;  %v2080_v13 = vld [vmem:[#allocation12 + $0x188] sm:$0xff]  ;;  %v2082_v15 = vld [vmem:[#allocation12 + $0x198] sm:$0xff]  ;;  %v1412_v27 = vpack.c.bf16 %v286_v6, %v284_v5  ;;  %v1350_v30 = vpack.c.bf16 %v2074_v10, %v2072_v9 }
  0xda   :  { %1335 = vmatpush1.bf16.msra.mxu1 %v1334_v37  ;;  %v2084_v16 = vld [vmem:[#allocation11 + $0x188] sm:$0xff]  ;;  %v2086_v17 = vld [vmem:[#allocation11 + $0x198] sm:$0xff]  ;;  %v2088_v18 = vld [vmem:[#allocation12 + $0x180] sm:$0xff]  ;;  %v1414_v31 = vpack.c.bf16 %v2078_v12, %v2076_v11  ;;  %v1352_v32 = vpack.c.bf16 %v2082_v15, %v2080_v13 }
  0xdb   :  { %1399 = vmatpush1.bf16.msra.mxu0 %v1398_v38  ;;  %1337 = vmatprep.subr.bf16.mxu1 %v1336_v39  ;;  %v2090_v19 = vld [vmem:[#allocation12 + $0x190] sm:$0xff]  ;;  %v2092_v20 = vld [vmem:[#allocation11 + $0x180] sm:$0xff]  ;;  %v2096_v23 = vld [vmem:[#allocation12 + $0x1a8] sm:$0xff]  ;;  %v1416_v33 = vpack.c.bf16 %v2086_v17, %v2084_v16 }
  0xdc   :  { %1401 = vmatprep.subr.bf16.mxu0 %v1400_v43  ;;  %v2094_v22 = vld [vmem:[#allocation11 + $0x190] sm:$0xff]  ;;  %v2098_v24 = vld [vmem:[#allocation12 + $0x1b8] sm:$0xff]  ;;  %v2100_v28 = vld [vmem:[#allocation11 + $0x1a8] sm:$0xff]  ;;  %v1354_v37 = vpack.c.bf16 %v2090_v19, %v2088_v18 }
  0xdd   :  { %v2102_v29 = vld [vmem:[#allocation11 + $0x1b8] sm:$0xff]  ;;  %v2112_v34 = vld [vmem:[#allocation12 + $0x1a0] sm:$0xff]  ;;  %v2114_v35 = vld [vmem:[#allocation12 + $0x1b0] sm:$0xff]  ;;  %v1418_v38 = vpack.c.bf16 %v2094_v22, %v2092_v20  ;;  %v1356_v39 = vpack.c.bf16 %v2098_v24, %v2096_v23 }
  0xde   :  { %1339 = vmatpush1.bf16.msra.mxu1 %v1338_v49  ;;  %v2119_v36 = vld [vmem:[%s2384_s30 + $0x8] sm:$0xff]  ;;  %v2130_v40 = vld [vmem:[%s2384_s30 + $0x18] sm:$0xff]  ;;  %v2136_v42 = vld [vmem:[%s2384_s30] sm:$0xff]  ;;  %v1420_v44 = vpack.c.bf16 %v2102_v29, %v2100_v28  ;;  %v1358_v49 = vpack.c.bf16 %v2114_v35, %v2112_v34 }
  0xdf   :  { %1403 = vmatpush1.bf16.msra.mxu0 %v1402_v51  ;;  %1341 = vmatprep.subr.bf16.mxu1 %v1340_v52  ;;  %v192_v41 = vrot.slane %v2119_v36, 4  ;;  %v2141_v43 = vld [vmem:[%s2384_s30 + $0x10] sm:$0xff]  ;;  %v204_v45 = vrot.slane %v2130_v40, 4  ;;  %v186_v46 = vrot.slane %v2136_v42, 4  ;;  %v1252_v48 = vld [vmem:[#allocation2] ss:$0 sm:$0xff] }
  0xe0   :  { %1405 = vmatprep.subr.bf16.mxu0 %v1404_v56  ;;  %v198_v47 = vrot.slane %v2141_v43, 4  ;;  %v2152_v52 = vld [vmem:[#allocation11 + $0x1a0] sm:$0xff]  ;;  %v293_v57 = vld [vmem:[#allocation11 + $0x1b0] sm:$0xff]  ;;  %v360_v58 = vld [vmem:[#allocation12 + $0x1c8] sm:$0xff]  ;;  %533 = vperm.xlu0 %1490, %v1252_v48  }
  0xe1   :  { %v222_v50 = vmax.f32 %v2119_v36, %v192_v41  ;;  %v193_v51 = vadd.f32 %v192_v41, %v2119_v36  ;;  %v234_v53 = vmax.f32 %v2130_v40, %v204_v45  ;;  %v205_v54 = vadd.f32 %v204_v45, %v2130_v40  ;;  %v362_v59 = vld [vmem:[#allocation12 + $0x1d8] sm:$0xff]  ;;  %v296_v13 = vld [vmem:[#allocation11 + $0x1c8] sm:$0xff]  ;;  %v359_v15 = vld [vmem:[#allocation12 + $0x1c0] sm:$0xff] }
  0xe2   :  { %1343 = vmatpush1.bf16.msra.mxu1 %v1342_v63  ;;  %v216_v55 = vmax.f32 %v2136_v42, %v186_v46  ;;  %v228_v56 = vmax.f32 %v2141_v43, %v198_v47  ;;  %v187_v62 = vadd.f32 %v186_v46, %v2136_v42  ;;  %v199_v63 = vadd.f32 %v198_v47, %v2141_v43  ;;  %v295_v23 = vld [vmem:[#allocation11 + $0x1c0] sm:$0xff]  ;;  %v297_v24 = vld [vmem:[#allocation11 + $0x1d0] sm:$0xff]  ;;  %v364_v41 = vld [vmem:[#allocation12 + $0x1e8] sm:$0xff] }
  0xe3   :  { %1407 = vmatpush1.bf16.msra.mxu0 %v1406_v7  ;;  %1345 = vmatprep.subr.bf16.mxu1 %v1344_v8  ;;  %v223_v60 = vrot.slane %v222_v50, 2  ;;  %v194_v61 = vrot.slane %v193_v51, 2  ;;  %v235_v0 = vrot.slane %v234_v53, 2  ;;  %v206_v2 = vrot.slane %v205_v54, 2 }
  0xe4   :  { %1409 = vmatprep.subr.bf16.mxu0 %v1408_v14  ;;  %v217_v3 = vrot.slane %v216_v55, 2  ;;  %v229_v4 = vrot.slane %v228_v56, 2  ;;  %v188_v7 = vrot.slane %v187_v62, 2  ;;  %v200_v8 = vrot.slane %v199_v63, 2  ;;  %v298_v14 = vld [vmem:[#allocation11 + $0x1d8] sm:$0xff] }
  0xe5   :  { %v224_v5 = vmax.f32 %v222_v50, %v223_v60  ;;  %v195_v6 = vadd.f32 %v194_v61, %v193_v51  ;;  %v1422_v9 = vpack.c.bf16 %v293_v57, %v2152_v52  ;;  %v1360_v10 = vpack.c.bf16 %v362_v59, %v360_v58  ;;  %v300_v50 = vld [vmem:[#allocation11 + $0x1e8] sm:$0xff]  ;;  %v302_v51 = vld [vmem:[#allocation11 + $0x1f8] sm:$0xff]  ;;  %v299_v58 = vld [vmem:[#allocation11 + $0x1e0] sm:$0xff] }
  0xe6   :  { %1347 = vmatpush1.bf16.msra.mxu1 %v1346_v21  ;;  %v236_v11 = vmax.f32 %v234_v53, %v235_v0  ;;  %v207_v12 = vadd.f32 %v206_v2, %v205_v54  ;;  %v189_v18 = vadd.f32 %v188_v7, %v187_v62  ;;  %v201_v19 = vadd.f32 %v200_v8, %v199_v63  ;;  %v361_v21 = vld [vmem:[#allocation12 + $0x1d0] sm:$0xff]  ;;  %v363_v53 = vld [vmem:[#allocation12 + $0x1e0] sm:$0xff] }
  0xe7   :  { %1411 = vmatpush1.bf16.msra.mxu0 %v1410_v25  ;;  %1349 = vmatprep.subr.bf16.mxu1 %v1348_v26  ;;  %v225_v16 = vrot.slane %v224_v5, 1  ;;  %v196_v17 = vrot.slane %v195_v6, 1  ;;  %v230_v28 = vmax.f32 %v228_v56, %v229_v4  ;;  %v1362_v47 = vpack.c.bf16 %v361_v21, %v359_v15  ;;  %v365_v54 = vld [vmem:[#allocation12 + $0x1f0] sm:$0xff] }
  0xe8   :  { %1413 = vmatprep.subr.bf16.mxu0 %v1412_v27  ;;  %v237_v25 = vrot.slane %v236_v11, 1  ;;  %v208_v26 = vrot.slane %v207_v12, 1  ;;  %v218_v27 = vmax.f32 %v216_v55, %v217_v3  ;;  %v1426_v48 = vpack.c.bf16 %v297_v24, %v295_v23  ;;  %v301_v59 = vld [vmem:[#allocation11 + $0x1f0] sm:$0xff] }
  0xe9   :  { %v226_v29 = vmax.f32 %v224_v5, %v225_v16  ;;  %v1428_v57 = vpack.c.bf16 %v302_v51, %v300_v50  ;;  %v1366_v35 = vpack.c.bf16 %v365_v54, %v363_v53  ;;  %v1430_v61 = vpack.c.bf16 %v301_v59, %v299_v58 }
  0xea   :  { %1351 = vmatpush1.bf16.msra.mxu1 %v1350_v30  ;;  %v197_v30 = vadd.f32 %v196_v17, %v195_v6  ;;  %v238_v45 = vmax.f32 %v236_v11, %v237_v25  ;;  %v209_v46 = vadd.f32 %v208_v26, %v207_v12  ;;  %v556_v3 = vlaneseq }
  0xeb   :  { %1415 = vmatpush1.bf16.msra.mxu0 %v1414_v31  ;;  %1353 = vmatprep.subr.bf16.mxu1 %v1352_v32  ;;  %v190_v31 = vrot.slane %v189_v18, 1  ;;  %v202_v32 = vrot.slane %v201_v19, 1  ;;  %v1825_v24 = vmov 1966171168   ;;  %v1826_v53 = vmov 0.0  }
  0xec   :  { %1417 = vmatprep.subr.bf16.mxu0 %v1416_v33  ;;  %v1424_v33 = vpack.c.bf16 %v298_v14, %v296_v13  ;;  %v212_v52 = vmul.f32 0.125, %v197_v30  ;;  %v373_v20 = vsel %vm371_vm0, %v238_v45, %v226_v29  ;;  %v214_v22 = vmul.f32 0.125, %v209_v46 }
  0xed   :  { %v191_v55 = vadd.f32 %v190_v31, %v189_v18  ;;  %v203_v56 = vadd.f32 %v202_v32, %v201_v19  ;;  %440 = vmatprep.mubr.f32.mxu1 %v373_v20  ;;  %v557_v4 = vshrl.u32 %v556_v3, 7  ;;  %v619_v5 = vand.u32 127, %v556_v3 }
  0xee   :  { %1355 = vmatpush1.bf16.msra.mxu1 %v1354_v37  ;;  %v366_v37 = vld [vmem:[#allocation12 + $0x1f8] sm:$0xff]  ;;  %v452_v34 = vsel %vm371_vm0, %v214_v22, %v212_v52  ;;  %v554_v25 = vunpack.c.l.s4 %v1825_v24  ;;  %v1039_v24 = vld [vmem:[#allocation17 + $0x18] sm:$0xff] }
  0xef   :  { %1419 = vmatpush1.bf16.msra.mxu0 %v1418_v38  ;;  %1357 = vmatprep.subr.bf16.mxu1 %v1356_v39  ;;  %v219_v38 = vrot.slane %v218_v27, 1  ;;  %v231_v39 = vrot.slane %v230_v28, 1  ;;  %v211_v62 = vmul.f32 0.125, %v191_v55  ;;  %v213_v63 = vmul.f32 0.125, %v203_v56 }
  0xf0   :  { %1421 = vmatprep.subr.bf16.mxu0 %v1420_v44  ;;  %v1364_v44 = vpack.c.bf16 %v366_v37, %v364_v41  ;;  %519 = vmatprep.mubr.f32.mxu0 %v452_v34  ;;  %v2171_v6 = vsub.s32 %v619_v5, %v557_v4  ;;  %v555_v26 = vunpack.c.0.s8 %v554_v25  ;;  %v2176_v32 = vsub.s32 0, %v557_v4  ;;  %v1036_v25 = vld [vmem:[#allocation17] sm:$0xff] }
  0xf1   :  { %v232_v60 = vmax.f32 %v230_v28, %v231_v39  ;;  %v451_v2 = vsel %vm371_vm0, %v213_v63, %v211_v62  ;;  %v793_v63 = vld [vmem:[%s2363_s12] sm:$0xff] }
  0xf2   :  { %1359 = vmatpush1.bf16.msra.mxu1 %v1358_v49  ;;  %v220_v49 = vmax.f32 %v218_v27, %v219_v38  ;;  %v2173_v28 = vsub.s32 %v555_v26, %v557_v4 }
  0xf3   :  { %1423 = vmatpush1.bf16.msra.mxu0 %v1422_v9  ;;  %1361 = vmatprep.subr.bf16.mxu1 %v1360_v10 }
  0xf4   :  { %1425 = vmatprep.subr.bf16.mxu0 %v1424_v33  ;;  %v372_v0 = vsel %vm371_vm0, %v232_v60, %v220_v49  ;;  %v581_v33 = vsub.s32 1, %v557_v4  ;;  %v708_v49 = vld [vmem:[%s2361_s10 + $0x18] sm:$0xff] }
  0xf6   :  { %1363 = vmatpush1.bf16.msra.mxu1 %v1362_v47 }
  0xf7   :  { %1427 = vmatpush1.bf16.msra.mxu0 %v1426_v48  ;;  %1365 = vmatprep.subr.bf16.mxu1 %v1364_v44  ;;  %v608_v44 = vld [vmem:[#allocation14] sm:$0xff] }
  0xf8   :  { %1429 = vmatprep.subr.bf16.mxu0 %v1428_v57 }
  0xfa   :  { %1367 = vmatpush1.bf16.msra.mxu1 %v1366_v35  ;;  %v707_v35 = vld [vmem:[%s2361_s10 + $0x10] sm:$0xff] }
  0xfb   :  { %1431 = vmatpush1.bf16.msra.mxu0 %v1430_v61  ;;  %v1436_v60 = vpack.c.bf16 %v708_v49, %v707_v35  ;;  %v1255_v61 = vld [vmem:[%s2360_s9] ss:$0 sm:$0xff] }
  0xfc   :  { %1277 = vmatprep.subr.mxu0 %v1826_v53 }
  0xfd   :  { %441 = vmatmul.mubr.f32.vlgmr.msra.gmra.mrb[0].mxu1 %v372_v0  ;;  %v794_v0 = vld [vmem:[%s2363_s12 + $0x8] sm:$0xff] }
  0xfe   :  { %520 = vmatmul.mubr.f32.vlgmr.msra.gmra.mrb[0].mxu0 %v451_v2  ;;  %1290 = vmatprep.mubr.msk.f32.mxu1 %vm1827_vm1, %v1826_v53  ;;  %v1439_v5 = vpack.c.bf16 %v794_v0, %v793_v63  ;;  %v1829_v63 = vmov 1  }
  0xff   :  { %1279 = vmatprep.mubr.msk.f32.mxu0 %vm1827_vm1, %v1826_v53  ;;  %1278 = vmatpush3.msra.mxu0 %v608_v44  ;;  %v895_v44 = vld [vmem:[#allocation15] sm:$0xff] }
 0x100   :  { %1494 = vset.pattern.permute.xlu0 %v1829_v63 }
 0x15f   :  { %v534_v8 = vpop.permute.xlu0 %533 }
 0x1d0   :  { %v442_v7 = vpop.f32.mrb[0].mxu1 }
 0x1d1   :  { %v521_v9 = vpop.f32.mrb[0].mxu0  ;;  %v444_v10 = vpop.f32.mrb[1].mxu1 }
 0x1d2   :  { %v522_v11 = vadd.f32 %v521_v9, %v442_v7  ;;  %v523_v12 = vpop.f32.mrb[1].mxu0  ;;  %v795_v7 = vld [vmem:[%s2363_s12 + $0x10] sm:$0xff] }
 0x1d3   :  { %v524_v13 = vadd.f32 %v523_v12, %v444_v10  ;;  %v1257_v10 = vld [vmem:[%s2362_s11] ss:$0 sm:$0xff]  ;;  %s1831_s11 = smov [#allocation19]  }
 0x1d4   :  { %v536_v14 = vadd.f32 %v534_v8, %v522_v11 }
 0x1d5   :  { %v537_v15 = vadd.f32 %v534_v8, %v524_v13  ;;  %v796_v8 = vld [vmem:[%s2363_s12 + $0x18] sm:$0xff]  ;;  %s1201_s12 = sshll.u32 %s1831_s11, 4  ;;  %s1202_s12 = int_to_ptr.vmem [resolvable:$true] %s1201_s12 }
 0x1d6   :  { %v1253_v16 = vmul.f32 -1.442695, %v536_v14  ;;  %v1442_v9 = vpack.c.bf16 %v796_v8, %v795_v7  ;;  %s1707_s4 = scalar_lea.vmem %s1202_s12, 512  ;;  %p1712_p3 = scmp.lt.s32.totalorder %s1202_s12, %s1202_s12 }
 0x1d7   :  { %v1254_v17 = vmul.f32 -1.442695, %v537_v15  ;;  %p1708_p2 = scmp.ne.s32.totalorder %s1202_s12, %s1707_s4  ;;  %p1713_p4 = scmp.lt.s32.totalorder %s1707_s4, %s1707_s4 }
 0x1d8   :  { %1497 = vpow2.f32 %v1253_v16  ;;  %v1259_v16 = vld [vmem:[%s2364_s13] ss:$0 sm:$0xff]  ;;  %s1832_s13 = smov [#allocation22]  }
 0x1d9   :  { %1499 = vpow2.f32 %v1254_v17  ;;  %s1225_s5 = sshll.u32 %s1832_s13, 4  ;;  %p1714_p5 = por %p1713_p4, %p1712_p3  ;;  %s1226_s5 = int_to_ptr.vmem [resolvable:$true] %s1225_s5 }
 0x1db   :  { %p1715_p6 = pnand %p1714_p5, %p1708_p2 }
 0x1e2   :  { %v1498_v18 = vpop.eup %1497 }
 0x1e3   :  { %v1500_v19 = vpop.eup %1499  ;;  %v544_v21 = vadd.f32 1.0, %v1498_v18 }
 0x1e4   :  { %v545_v23 = vadd.f32 1.0, %v1500_v19 }
 0x1e5   :  { %1501 = vrcp.f32 %v544_v21 }
 0x1e6   :  { %1503 = vrcp.f32 %v545_v23  ;;  %v1037_v23 = vld [vmem:[#allocation17 + $0x8] sm:$0xff] }
 0x1e7   :  { %v1448_v26 = vpack.c.bf16 %v1039_v24, %v1037_v23 }
 0x1e9   :  { %1449 = vmatprep.subr.bf16.mxu0 %v1448_v26 }
 0x1ef   :  { %v1502_v27 = vpop.eup %1501 }
 0x1f0   :  { %v1504_v29 = vpop.eup %1503 }
 0x1f1   :  { %v552_v30 = vcombine.low %v1502_v27, %v1504_v29  ;;  %v1038_v27 = vld [vmem:[#allocation17 + $0x10] sm:$0xff]  ;;  %v1041_v29 = vld [vmem:[#allocation17 + $0x28] sm:$0xff] }
 0x1f3   :  { %v559_v31 = vrot.slane %v552_v30, %v2173_v28  ;;  %v1043_v30 = vld [vmem:[#allocation17 + $0x38] sm:$0xff] }
 0x1f5   :  { %v567_v41 = vrot.slane %v559_v31, %v2173_v28  ;;  %v560_v37 = vcombine.high %v559_v31, %v559_v31  ;;  %v1450_v31 = vpack.c.bf16 %v1038_v27, %v1036_v25 }
 0x1f7   :  { %v578_v45 = vrot.slane %v567_v41, %v2176_v32  ;;  %v582_v46 = vrot.slane %v567_v41, %v581_v33  ;;  %v574_v47 = vrot.slane %v560_v37, %v2173_v28  ;;  %v1040_v41 = vld [vmem:[#allocation17 + $0x20] sm:$0xff]  ;;  %v1042_v37 = vld [vmem:[#allocation17 + $0x30] sm:$0xff] }
 0x1f9   :  { %v595_v48 = vmul.f32 %v578_v45, %v2136_v42  ;;  %v596_v50 = vmul.f32 %v582_v46, %v2119_v36  ;;  %v586_v51 = vrot.slane %v574_v47, %v2176_v32  ;;  %v590_v52 = vrot.slane %v574_v47, %v581_v33  ;;  %v705_v36 = vld [vmem:[%s2361_s10] sm:$0xff]  ;;  %v1045_v45 = vld [vmem:[#allocation17 + $0x48] sm:$0xff] }
 0x1fa   :  { %v1828_v42 = vmov 0.0|0.0   ;;  %v1452_v33 = vpack.c.bf16 %v1043_v30, %v1041_v29  ;;  %v1047_v46 = vld [vmem:[#allocation17 + $0x58] sm:$0xff]  ;;  %v1454_v47 = vpack.c.bf16 %v1042_v37, %v1040_v41 }
 0x1fb   :  { %v599_v20 = vadd.f32 %v596_v50, %v595_v48  ;;  %v597_v22 = vmul.f32 %v586_v51, %v2141_v43  ;;  %v598_v38 = vmul.f32 %v590_v52, %v2130_v40  ;;  %v706_v40 = vld [vmem:[%s2361_s10 + $0x8] sm:$0xff]  ;;  %1432 = vmatprep.subr.bf16.mxu1 %v1828_v42  ;;  %v1046_v50 = vld [vmem:[#allocation17 + $0x50] sm:$0xff]  ;;  %v1456_v51 = vpack.c.bf16 %v1047_v46, %v1045_v45  ;;  %v1049_v52 = vld [vmem:[#allocation17 + $0x68] sm:$0xff] }
 0x1fc   :  { %v1433_v43 = vpack.c.bf16 %v706_v40, %v705_v36  ;;  %v1044_v48 = vld [vmem:[#allocation17 + $0x40] sm:$0xff]  ;;  %v897_v36 = vld [vmem:[#allocation15 + $0x10] sm:$0xff] }
 0x1fd   :  { %600 = vadd.xlane.f32.xlu0 %v599_v20  ;;  %v602_v39 = vadd.f32 %v598_v38, %v597_v22  ;;  %v896_v20 = vld [vmem:[#allocation15 + $0x8] sm:$0xff]  ;;  %v898_v22 = vld [vmem:[#allocation15 + $0x18] sm:$0xff]  ;;  %v1446_v40 = vpack.c.bf16 %v897_v36, %v895_v44 }
 0x1fe   :  { %1434 = vmatpush3.bf16.msra.mxu1 %v1433_v43  ;;  %v1051_v38 = vld [vmem:[#allocation17 + $0x78] sm:$0xff] }
 0x1ff   :  { %603 = vadd.xlane.f32.xlu1 %v602_v39  ;;  %1435 = vmatprep.subr.bf16.mxu1 %v1828_v42  ;;  %v1444_v39 = vpack.c.bf16 %v898_v22, %v896_v20  ;;  %v1460_v43 = vpack.c.bf16 %v1051_v38, %v1049_v52 }
 0x202   :  { %1437 = vmatpush3.bf16.msra.mxu1 %v1436_v60 }
 0x203   :  { %1438 = vmatprep.subr.bf16.mxu1 %v1828_v42 }
 0x28a   :  { %v601_v54 = vpop.xlane.xlu0 %600 }
 0x28b   :  { %v606_v55 = vmul.f32 0.00390625, %v601_v54  ;;  %v1048_v54 = vld [vmem:[#allocation17 + $0x60] sm:$0xff] }
 0x28c   :  { %v604_v56 = vpop.xlane.xlu1 %603 }
 0x28d   :  { %v607_v57 = vmul.f32 0.00390625, %v604_v56  ;;  %v623_v58 = vrot.slane %v606_v55, %v2171_v6  ;;  %v1050_v55 = vld [vmem:[#allocation17 + $0x70] sm:$0xff]  ;;  %v893_v56 = vld [vmem:[#allocation6] sm:$0xff] }
 0x28f   :  { %v627_v59 = vrot.slane %v607_v57, %v2171_v6  ;;  %v1462_v57 = vpack.c.bf16 %v1050_v55, %v1048_v54 }
 0x291   :  { %v628_v34 = vsel %vm371_vm0, %v627_v59, %v623_v58  ;;  %v894_v58 = vld [vmem:[#allocation6 + $0x8] sm:$0xff]  ;;  %v1034_v59 = vld [vmem:[#allocation8] sm:$0xff] }
 0x292   :  { %1280 = vmatmul.mubr.msk.f32.vlgmr.msra.gmra.mrb[2].mxu0 %vm629_vm2, %v628_v34  ;;  %v1035_v34 = vld [vmem:[#allocation8 + $0x8] sm:$0xff] }
 0x293   :  { %1123 = vmatprep.mubr.f32.mxu0 %v1826_v53  ;;  %1451 = vmatpush1.bf16.msra.mxu0 %v1450_v31 }
 0x294   :  { %1453 = vmatprep.subr.bf16.mxu0 %v1452_v33 }
 0x297   :  { %1455 = vmatpush1.bf16.msra.mxu0 %v1454_v47 }
 0x298   :  { %1457 = vmatprep.subr.bf16.mxu0 %v1456_v51 }
 0x365   :  { %v698_v62 = vpop.f32.mrb[2].mxu0 }
 0x366   :  { %v699_v2 = vadd.f32 %v1255_v61, %v698_v62  ;;  %v1281_v3 = vpop.f32.mrb[3].mxu0 }
 0x368   :  { %vm702_vm3 = vcmp.gt.f32.partialorder %v699_v2, 0.0  ;;  %v703_v4 = vmul.f32 0.01, %v699_v2 }
 0x36a   :  { %v704_v6 = vsel %vm702_vm3, %v699_v2, %v703_v4 }
 0x36b   :  { %1291 = vmatmul.mubr.msk.f32.vlgmr.msra.gmra.mrb[2].mxu1 %vm716_vm4, %v704_v6 }
 0x36c   :  { %1440 = vmatpush3.bf16.msra.mxu1 %v1439_v5  ;;  %1301 = vmatprep.mubr.msk.f32.mxu1 %vm1827_vm1, %v1826_v53 }
 0x36d   :  { %1441 = vmatprep.subr.bf16.mxu1 %v1828_v42  ;;  %v1458_v42 = vpack.c.bf16 %v1046_v50, %v1044_v48 }
 0x36f   :  { %1459 = vmatpush1.bf16.msra.mxu0 %v1458_v42 }
 0x370   :  { %1443 = vmatpush3.bf16.msra.mxu1 %v1442_v9  ;;  %1461 = vmatprep.subr.bf16.mxu0 %v1460_v43 }
 0x371   :  { %1445 = vmatprep.subr.bf16.mxu1 %v1444_v39 }
 0x373   :  { %1463 = vmatpush1.bf16.msra.mxu0 %v1462_v57 }
 0x376   :  { %1263 = vmatmul.mubr.msk.f32.vlgmr.msra.gmra.mrb[4].mxu0 %vm1052_vm8, %v1034_v59 }
 0x377   :  { %1129 = vmatprep.mubr.f32.mxu0 %v1826_v53 }
 0x37a   :  { %1264 = vmatmul.mubr.msk.f32.gmra.mrb[6].mxu0 %vm1052_vm8, %v1035_v34 }
 0x43e   :  { %v786_v11 = vpop.f32.mrb[2].mxu1 }
 0x43f   :  { %v787_v12 = vadd.f32 %v1257_v10, %v786_v11  ;;  %v1292_v13 = vpop.f32.mrb[3].mxu1 }
 0x441   :  { %vm790_vm5 = vcmp.gt.f32.partialorder %v787_v12, 0.0  ;;  %v791_v14 = vmul.f32 0.01, %v787_v12 }
 0x443   :  { %v792_v15 = vsel %vm790_vm5, %v787_v12, %v791_v14 }
 0x444   :  { %1302 = vmatmul.mubr.msk.f32.vlgmr.msra.gmra.mrb[4].mxu1 %vm716_vm4, %v792_v15 }
 0x445   :  { %970 = vmatprep.mubr.f32.mxu1 %v1826_v53  ;;  %1447 = vmatpush1.bf16.msra.mxu1 %v1446_v40 }
 0x448   :  { %1261 = vmatmul.mubr.msk.f32.vlgmr.msra.gmra.mrb[6].mxu1 %vm899_vm7, %v893_v56 }
 0x449   :  { %976 = vmatprep.mubr.f32.mxu1 %v1826_v53  ;;  %v2240_v2 = vpop.f32.mrb[4].mxu0 }
 0x44a   :  { %1136 = vst [vmem:[#allocation21] sm:$0xff] %v2240_v2  ;;  %v2249_v11 = vpop.f32.mrb[5].mxu0 }
 0x44b   :  { %1137 = vst [vmem:[#allocation21 + $0x8] sm:$0xff] %v2249_v11 }
 0x44c   :  { %1262 = vmatmul.mubr.msk.f32.gmra.mrb[8].mxu1 %vm899_vm7, %v894_v58 }
 0x44d   :  { %v2254_v13 = vpop.f32.mrb[6].mxu0 }
 0x44e   :  { %1138 = vst [vmem:[#allocation21 + $0x10] sm:$0xff] %v2254_v13  ;;  %v2257_v14 = vpop.f32.mrb[7].mxu0 }
 0x44f   :  { %1139 = vst [vmem:[#allocation21 + $0x18] sm:$0xff] %v2257_v14 }
 0x517   :  { %v873_v17 = vpop.f32.mrb[4].mxu1 }
 0x518   :  { %v874_v18 = vadd.f32 %v1259_v16, %v873_v17  ;;  %v1303_v19 = vpop.f32.mrb[5].mxu1  ;;  %v2267_v16 = vld [vmem:[#allocation9] sm:$0xff]  ;;  %v2269_v17 = vld [vmem:[#allocation9 + $0x8] sm:$0xff] }
 0x519   :  { %1160 = vst [vmem:[#allocation22] sm:$0xff] %v2267_v16  ;;  %1161 = vst [vmem:[#allocation22 + $0x8] sm:$0xff] %v2269_v17  ;;  %v2275_v19 = vld [vmem:[#allocation9 + $0x18] sm:$0xff] }
 0x51a   :  { %v878_v21 = vsel %vm877_vm6, %v874_v18, -inf  ;;  %1163 = vst [vmem:[#allocation22 + $0x18] sm:$0xff] %v2275_v19 }
 0x51b   :  { %879 = vmax.xlane.f32.xlu1 %v878_v21  ;;  %v2237_v0 = vpop.f32.mrb[6].mxu1 }
 0x51c   :  { %983 = vst [vmem:[#allocation19] sm:$0xff] %v2237_v0  ;;  %v2247_v10 = vpop.f32.mrb[7].mxu1 }
 0x51d   :  { %984 = vst [vmem:[#allocation19 + $0x8] sm:$0xff] %v2247_v10 }
 0x51f   :  { %v2260_v15 = vpop.f32.mrb[8].mxu1 }
 0x520   :  { %985 = vst [vmem:[#allocation19 + $0x10] sm:$0xff] %v2260_v15 }
 0x5a8   :  { %v880_v35 = vpop.xlane.xlu1 %879 }
 0x5a9   :  { %v881_v49 = vsub.f32 %v874_v18, %v880_v35  ;;  %v2273_v18 = vld [vmem:[#allocation9 + $0x10] sm:$0xff] }
 0x5aa   :  { %1162 = vst [vmem:[#allocation22 + $0x10] sm:$0xff] %v2273_v18 }
 0x5ab   :  { %v882_v60 = vmul.f32 1.442695, %v881_v49 }
 0x5ad   :  { %1505 = vpow2.f32 %v882_v60 }
 0x5b7   :  { %v1506_v61 = vpop.eup %1505 }
 0x5b8   :  { %v884_v62 = vsel %vm877_vm6, %v1506_v61, 0.0 }
 0x5b9   :  { %885 = vadd.xlane.f32.xlu1 %v884_v62 }
 0x646   :  { %v886_v53 = vpop.xlane.xlu1 %885 }
 0x647   :  { %1507 = vrcp.f32 %v886_v53 }
 0x651   :  { %v1508_v3 = vpop.eup %1507 }
 0x652   :  { %v888_v4 = vmul.f32 %v1508_v3, %v1506_v61 }
 0x654   :  { %v994_v5 = vrot.slane %v888_v4, %v2173_v28 }
 0x656   :  { %v1002_v6 = vrot.slane %v994_v5, %v2173_v28  ;;  %v995_v7 = vcombine.high %v994_v5, %v994_v5 }
 0x658   :  { %v1013_v8 = vrot.slane %v1002_v6, %v2176_v32  ;;  %v1009_v9 = vrot.slane %v995_v7, %v2173_v28  ;;  %v1830_v28 = vmov 2  }
 0x65a   :  { %1019 = vperm.xlu1 %1491, %v1013_v8   ;;  %v1017_v12 = vrot.slane %v1009_v9, %v2176_v32  ;;  %v2264_v32 = vpop.f32.mrb[9].mxu1 }
 0x65b   :  { %986 = vst [vmem:[#allocation19 + $0x18] sm:$0xff] %v2264_v32 }
 0x65c   :  { %1145 = vperm.xlu0 %1494, %v1017_v12  }
 0x65e   :  { %1492 = vset.pattern.permute.xlu1 %v1829_v63 }
 0x65f   :  { %1141 = vperm.xlu1 %1492, %v1013_v8  }
 0x660   :  { %1496 = vset.pattern.permute.xlu0 %v1830_v28 }
 0x663   :  { %1493 = vset.pattern.permute.xlu1 %v1824_v1 }
 0x664   :  { %1023 = vperm.xlu1 %1493, %v1017_v12  }
 0x668   :  { %1495 = vset.pattern.permute.xlu1 %v1830_v28 }
 0x669   :  { %1165 = vperm.xlu1 %1495, %v1013_v8  }
 0x66d   :  { %1169 = vperm.xlu1 %1495, %v1017_v12  }
 0x66e   :  { %1718 = shalt.err (!%p1715_p6)
}
 0x66f   :  { %s1719_s24 = scalar_lea.hbm %s2368_s17, 512 }
 0x670   :  { %p1720_p7 = scmp.ne.s32.totalorder %s2368_s17, %s1719_s24  ;;  %p1723_p8 = scmp.lt.u32.totalorder %s1719_s24, %s2368_s17 }
 0x672   :  { %p1725_p9 = pnand %p1723_p8, %p1720_p7 }
 0x674   :  { %1728 = shalt.err (!%p1725_p9)
}
 0x675   :  { %1207 = dma.vmem_to_hbm [thread:$0]  %s1202_s12, 512, %s2368_s17, [#allocation20], %s1816_s2, %s1816_s2, %s1817_s29  }
 0x676   :  { %s1729_s8 = scalar_lea.vmem %s1226_s5, 512  ;;  %p1734_p11 = scmp.lt.s32.totalorder %s1226_s5, %s1226_s5 }
 0x677   :  { %p1730_p10 = scmp.ne.s32.totalorder %s1226_s5, %s1729_s8  ;;  %p1735_p12 = scmp.lt.s32.totalorder %s1729_s8, %s1729_s8 }
 0x679   :  { %p1736_p13 = por %p1735_p12, %p1734_p11 }
 0x67b   :  { %p1737_p0 = pnand %p1736_p13, %p1730_p10 }
 0x67d   :  { %1740 = shalt.err (!%p1737_p0)
}
 0x67e   :  { %s1741_s3 = scalar_lea.hbm %s2370_s19, 512 }
 0x67f   :  { %p1742_p1 = scmp.ne.s32.totalorder %s2370_s19, %s1741_s3  ;;  %p1745_p2 = scmp.lt.u32.totalorder %s1741_s3, %s2370_s19 }
 0x681   :  { %p1747_p3 = pnand %p1745_p2, %p1742_p1 }
 0x683   :  { %1750 = shalt.err (!%p1747_p3)
}
 0x684   :  { %1231 = dma.vmem_to_hbm [thread:$0]  %s1226_s5, 512, %s2370_s19, [#allocation23], %s1816_s2, %s1816_s2, %s1817_s29  }
 0x685   :  { %s1833_s26 = smov [#allocation21]  }
 0x686   :  { %s1213_s22 = sshll.u32 %s1833_s26, 4  ;;  %s1214_s22 = int_to_ptr.vmem [resolvable:$true] %s1213_s22 }
 0x687   :  { %s1751_s20 = scalar_lea.vmem %s1214_s22, 512  ;;  %p1756_p5 = scmp.lt.s32.totalorder %s1214_s22, %s1214_s22 }
 0x688   :  { %p1752_p4 = scmp.ne.s32.totalorder %s1214_s22, %s1751_s20  ;;  %p1757_p6 = scmp.lt.s32.totalorder %s1751_s20, %s1751_s20 }
 0x68a   :  { %p1758_p7 = por %p1757_p6, %p1756_p5 }
 0x68c   :  { %p1759_p8 = pnand %p1758_p7, %p1752_p4 }
 0x68e   :  { %1762 = shalt.err (!%p1759_p8)
}
 0x68f   :  { %s1763_s13 = scalar_lea.hbm %s2369_s18, 512 }
 0x690   :  { %p1764_p9 = scmp.ne.s32.totalorder %s2369_s18, %s1763_s13  ;;  %p1767_p10 = scmp.lt.u32.totalorder %s1763_s13, %s2369_s18 }
 0x692   :  { %p1769_p11 = pnand %p1767_p10, %p1764_p9 }
 0x694   :  { %1772 = shalt.err (!%p1769_p11)
}
 0x695   :  { %1219 = dma.vmem_to_hbm [thread:$0]  %s1214_s22, 512, %s2369_s18, [#allocation20], %s1816_s2, %s1816_s2, %s1817_s29   ;;  %v889_v24 = vld [vmem:[#allocation3] sm:$0xff]  ;;  %v890_v25 = vld [vmem:[#allocation3 + $0x8] sm:$0xff]  ;;  %v891_v45 = vld [vmem:[#allocation3 + $0x10] sm:$0xff] }
 0x696   :  { %v892_v47 = vld [vmem:[#allocation3 + $0x18] sm:$0xff]  ;;  %s1834_s18 = smov [#allocation18]  }
 0x697   :  { %s1189_s25 = sshll.u32 %s1834_s18, 4  ;;  %s1190_s25 = int_to_ptr.vmem [resolvable:$true] %s1189_s25 }
 0x698   :  { %s1773_s27 = scalar_lea.vmem %s1190_s25, 512  ;;  %p1778_p13 = scmp.lt.s32.totalorder %s1190_s25, %s1190_s25 }
 0x699   :  { %p1774_p12 = scmp.ne.s32.totalorder %s1190_s25, %s1773_s27  ;;  %p1779_p0 = scmp.lt.s32.totalorder %s1773_s27, %s1773_s27 }
 0x69b   :  { %p1780_p1 = por %p1779_p0, %p1778_p13 }
 0x69d   :  { %p1781_p2 = pnand %p1780_p1, %p1774_p12 }
 0x6d9   :  { %v1020_v1 = vpop.permute.xlu1 %1019 }
 0x6da   :  { %v1026_v21 = vmul.f32 %v1020_v1, %v2237_v0  ;;  %v1027_v23 = vmul.f32 %v1020_v1, %v2247_v10 }
 0x6db   :  { %v1146_v37 = vpop.permute.xlu0 %1145 }
 0x6dc   :  { %v1030_v27 = vadd.f32 %v1026_v21, %v889_v24  ;;  %v1031_v29 = vadd.f32 %v1027_v23, %v890_v25  ;;  %v1150_v51 = vmul.f32 %v1146_v37, %v2254_v13  ;;  %v1151_v52 = vmul.f32 %v1146_v37, %v2257_v14 }
 0x6de   :  { %v1142_v26 = vpop.permute.xlu1 %1141 }
 0x6df   :  { %v1148_v30 = vmul.f32 %v1142_v26, %v2240_v2  ;;  %v1149_v31 = vmul.f32 %v1142_v26, %v2249_v11 }
 0x6e1   :  { %v1152_v33 = vadd.f32 %v1148_v30, %v1030_v27  ;;  %v1153_v41 = vadd.f32 %v1149_v31, %v1031_v29 }
 0x6e3   :  { %v1024_v46 = vpop.permute.xlu1 %1023 }
 0x6e4   :  { %v1028_v48 = vmul.f32 %v1024_v46, %v2260_v15  ;;  %v1029_v50 = vmul.f32 %v1024_v46, %v2264_v32 }
 0x6e6   :  { %v1032_v20 = vadd.f32 %v1028_v48, %v891_v45  ;;  %v1033_v22 = vadd.f32 %v1029_v50, %v892_v47 }
 0x6e8   :  { %v1166_v38 = vpop.permute.xlu1 %1165  ;;  %v1154_v39 = vadd.f32 %v1150_v51, %v1032_v20  ;;  %v1155_v44 = vadd.f32 %v1151_v52, %v1033_v22 }
 0x6e9   :  { %v1172_v36 = vmul.f32 %v1166_v38, %v2267_v16  ;;  %v1173_v40 = vmul.f32 %v1166_v38, %v2269_v17 }
 0x6eb   :  { %v1176_v42 = vadd.f32 %v1172_v36, %v1152_v33  ;;  %v1177_v43 = vadd.f32 %v1173_v40, %v1153_v41 }
 0x6ec   :  { %v1170_v54 = vpop.permute.xlu1 %1169 }
 0x6ed   :  { %1180 = vst [vmem:[#allocation18] sm:$0xff] %v1176_v42  ;;  %1181 = vst [vmem:[#allocation18 + $0x8] sm:$0xff] %v1177_v43  ;;  %v1174_v55 = vmul.f32 %v1170_v54, %v2273_v18  ;;  %v1175_v56 = vmul.f32 %v1170_v54, %v2275_v19 }
 0x6ef   :  { %v1178_v57 = vadd.f32 %v1174_v55, %v1154_v39  ;;  %v1179_v58 = vadd.f32 %v1175_v56, %v1155_v44 }
 0x6f1   :  { %1182 = vst [vmem:[#allocation18 + $0x10] sm:$0xff] %v1178_v57  ;;  %1183 = vst [vmem:[#allocation18 + $0x18] sm:$0xff] %v1179_v58 }
 0x6f2   :  { %1784 = shalt.err (!%p1781_p2)
}
 0x6f3   :  { %s2385_s7 = sld [smem:[#allocation36_spill]] }
 0x6f9   :  { %s1785_s16 = scalar_lea.hbm %s2385_s7, 512 }
 0x6fa   :  { %p1786_p3 = scmp.ne.s32.totalorder %s2385_s7, %s1785_s16  ;;  %p1789_p4 = scmp.lt.u32.totalorder %s1785_s16, %s2385_s7 }
 0x6fc   :  { %p1791_p5 = pnand %p1789_p4, %p1786_p3 }
 0x6fe   :  { %1794 = shalt.err (!%p1791_p5)
}
 0x6ff   :  { %1195 = dma.vmem_to_hbm [thread:$0]  %s1190_s25, 512, %s2385_s7, [#allocation5], %s1816_s2, %s1816_s2, %s1817_s29  }
 0x700   :  { %1805 = dma.done.wait [#allocation5], 512  }
 0x701   :  { %1806 = vsyncadd [#allocation5], 4294966784 }
 0x702   :  { %1807 = dma.done.wait [#allocation20], 1024  }
 0x703   :  { %1808 = vsyncadd [#allocation20], 4294966272 }
 0x704   :  { %1809 = dma.done.wait [#allocation23], 512  }
 0x705   :  { %1810 = vsyncadd [#allocation23], 4294966784 }
 0x706   :  { %1244 = vsyncpa [#allocation4], 1 }
 0x707   :  { %1245 = vsyncpa [#allocation7], 1 }
 0x708   :  { %1246 = vsyncpa [#allocation10], 1 }
 0x709   :  { %1247 = vsyncpa [#allocation13], 1 }
 0x70a   :  { %1248 = vsyncpa [#allocation16], 1 }
 0x70b   :  { %1249 = vsyncpa [#allocation5], 1 }
 0x70c   :  { %1250 = vsyncpa [#allocation20], 1 }
 0x70d   :  { %1251 = vsyncpa [#allocation23], 1 }

</bundles_post_ra>
